<compile_context>
chip_gen: v7x
topology: tpu7x:2x2x1
jax: 0.10.0
libtpu: 0.0.40
codegen_flags: <defaults>
</compile_context>

<pallas_src>
import numpy as np
import jax
import jax.numpy as jnp
from jax.experimental import pallas as pl
from jax.experimental.pallas import tpu as pltpu


# ---------------------------------------------------------------------------
# Kernel (built as a closure over a static per-layer plan)
# ---------------------------------------------------------------------------
def _make_kernel(plan, n_b_ops):
    def kernel(*refs):
        x_ref = refs[0]
        b_refs = refs[1:1 + n_b_ops]
        s_ref = refs[1 + n_b_ops]
        bias_ref = refs[2 + n_b_ops]
        o_ref = refs[3 + n_b_ops]

        a = x_ref[...]                                        # [N*H, W*C] input slab
        for L in plan:
            # One MXU matmul per layer covering all three kernel rows (kh-concat).
            b_cat = b_refs[L["b_op"]][L["b_row0"]:L["b_row0"] + L["b_rows"], :]
            p = jnp.dot(a, b_cat, preferred_element_type=jnp.float32)

            wp = L["wpad"]                                    # 128-aligned kh block
            acc = bias_ref[L["bias_row0"]:L["bias_row0"] + 1, 0:wp]
            for kh, r0 in enumerate(L["s_row0"]):
                s_kh = s_ref[r0:r0 + L["rows_out"], 0:L["rows_in"]]
                acc = acc + jnp.dot(s_kh, p[:, kh * wp:(kh + 1) * wp],
                                    preferred_element_type=jnp.float32)

            if L["act"] == "relu":
                a = jnp.maximum(acc, 0.0)
            else:                                             # sigmoid epilogue
                a = 1.0 / (1.0 + jnp.exp(-acc))
        o_ref[...] = a                                        # lane-dense [N*H, 128]
    return kernel


# ---------------------------------------------------------------------------
# One-time weight preprocessing: PyTorch layouts -> packed, lane-padded mats
# ---------------------------------------------------------------------------
def _round_up(x, m):
    return (x + m - 1) // m * m


def _conv_taps(Hin, Win, K, stride, pad, transposed, out_pad, N):
    """Width tap one-hot q[wi, wo, kw] and height selection s[kh, N*Ho, N*Hin]."""
    if not transposed:
        Ho = (Hin + 2 * pad - K) // stride + 1
        Wo = (Win + 2 * pad - K) // stride + 1
        q = np.zeros((Win, Wo, K), np.float32)
        for wo in range(Wo):
            for kw in range(K):
                wi = stride * wo + kw - pad
                if 0 <= wi < Win:
                    q[wi, wo, kw] = 1.0
        s = np.zeros((K, N * Ho, N * Hin), np.float32)
        for kh in range(K):
            for n in range(N):
                for ho in range(Ho):
                    hi = stride * ho + kh - pad
                    if 0 <= hi < Hin:
                        s[kh, n * Ho + ho, n * Hin + hi] = 1.0
    else:
        Ho = (Hin - 1) * stride - 2 * pad + K + out_pad
        Wo = (Win - 1) * stride - 2 * pad + K + out_pad
        q = np.zeros((Win, Wo, K), np.float32)
        for wi in range(Win):
            for wo in range(Wo):
                kw = wo + pad - stride * wi
                if 0 <= kw < K:
                    q[wi, wo, kw] = 1.0
        s = np.zeros((K, N * Ho, N * Hin), np.float32)
        for kh in range(K):
            for n in range(N):
                for ho in range(Ho):
                    t = ho + pad - kh
                    if t >= 0 and t % stride == 0 and t // stride < Hin:
                        s[kh, n * Ho + ho, n * Hin + t // stride] = 1.0
    return q, s, Ho, Wo


def precompute_kernel_params(params, N, H, W):
    K = 3
    layer_defs = [
        dict(w=params["enc1_w"], b=params["enc1_b"], stride=2, pad=1,
             transposed=False, out_pad=0, act="relu"),
        dict(w=params["enc2_w"], b=params["enc2_b"], stride=2, pad=1,
             transposed=False, out_pad=0, act="relu"),
        dict(w=params["dec1_w"], b=params["dec1_b"], stride=2, pad=1,
             transposed=True, out_pad=1, act="relu"),
        dict(w=params["dec2_w"], b=params["dec2_b"], stride=2, pad=1,
             transposed=True, out_pad=1, act="relu"),
        dict(w=params["dec3_w"], b=params["dec3_b"], stride=1, pad=1,
             transposed=False, out_pad=0, act="sigmoid"),
    ]

    cur_H, cur_W, cur_C = H, W, 1
    cur_lanes = cur_W * cur_C              # lane width of the incoming slab

    plan = []
    b_groups = {}                          # B lane width -> list of row blocks
    s_blocks, s_off = [], 0                # packed height-selection matrices
    bias_rows = []

    for li, L in enumerate(layer_defs):
        w = np.asarray(L["w"], np.float32)
        b = np.asarray(L["b"], np.float32)
        if L["transposed"]:
            Cin, Cout = w.shape[0], w.shape[1]
        else:
            Cout, Cin = w.shape[0], w.shape[1]
        assert Cin == cur_C

        q, s, Ho, Wo = _conv_taps(cur_H, cur_W, K, L["stride"], L["pad"],
                                  L["transposed"], L["out_pad"], N)
        eq = "vok,ichk->hvioc" if L["transposed"] else "vok,cihk->hvioc"
        bm = np.einsum(eq, q, w).reshape(K, cur_W * Cin, Wo * Cout)

        wpad = _round_up(Wo * Cout, 128)   # per-kh lane block padded to >=128
        b_cat = np.zeros((cur_lanes, K * wpad), np.float32)
        for kh in range(K):
            b_cat[:cur_W * Cin, kh * wpad: kh * wpad + Wo * Cout] = bm[kh]

        lane_w = K * wpad
        grp = b_groups.setdefault(lane_w, [])
        b_row0 = sum(blk.shape[0] for blk in grp)
        grp.append(b_cat)

        rows_out, rows_in = N * Ho, N * cur_H
        s_row0 = []
        for kh in range(K):
            s_row0.append(s_off)
            s_blocks.append((s_off, s[kh]))
            s_off += _round_up(rows_out, 8)          # keep offsets sublane-aligned

        bias_full = np.zeros((wpad,), np.float32)
        bias_full[:Wo * Cout] = np.tile(b, Wo)
        bias_rows.append(bias_full)

        plan.append(dict(b_lane_w=lane_w, b_row0=b_row0, b_rows=cur_lanes,
                         wpad=wpad, s_row0=tuple(s_row0),
                         rows_out=rows_out, rows_in=rows_in,
                         bias_row0=8 * li, act=L["act"]))

        cur_H, cur_W, cur_C = Ho, Wo, Cout
        cur_lanes = wpad

    # Pack B row-blocks by lane width (2 operands for this net: 384 & 768 wide)
    lane_ws = sorted(b_groups)
    for Lp in plan:
        Lp["b_op"] = lane_ws.index(Lp["b_lane_w"])
    b_ops = tuple(jnp.asarray(np.concatenate(b_groups[lw], axis=0))
                  for lw in lane_ws)

    # Pack all 15 S matrices into one slab (tiny; sliced at static offsets)
    s_lanes = _round_up(max(blk.shape[1] for _, blk in s_blocks), 8)
    s_pack = np.zeros((_round_up(s_off, 8), s_lanes), np.float32)
    for off, blk in s_blocks:
        s_pack[off:off + blk.shape[0], :blk.shape[1]] = blk

    # Pack all bias rows (one row per layer, 8-row stride for aligned slices)
    bias_w = _round_up(max(r.shape[0] for r in bias_rows), 128)
    bias_pack = np.zeros((8 * len(bias_rows), bias_w), np.float32)
    for i, r in enumerate(bias_rows):
        bias_pack[8 * i, :r.shape[0]] = r

    ops = b_ops + (jnp.asarray(s_pack), jnp.asarray(bias_pack))
    meta = dict(plan=tuple(plan), n_b_ops=len(b_ops),
                out_rows=plan[-1]["rows_out"], out_wpad=plan[-1]["wpad"],
                out_H=cur_H, out_W=cur_W, out_C=cur_C)
    return ops, meta


# ---------------------------------------------------------------------------
# Forward (hot path: exactly one grid-less pallas_call, 5 input operands)
# ---------------------------------------------------------------------------
def make_denoise_forward(meta):
    kernel = _make_kernel(meta["plan"], meta["n_b_ops"])
    n_in = 1 + meta["n_b_ops"] + 2
    call = pl.pallas_call(
        kernel,
        out_shape=jax.ShapeDtypeStruct((meta["out_rows"], meta["out_wpad"]),
                                       jnp.float32),
        in_specs=[pl.BlockSpec(memory_space=pltpu.MemorySpace.VMEM)] * n_in,
        out_specs=pl.BlockSpec(memory_space=pltpu.MemorySpace.VMEM),
    )
    Ho, Wo, Co = meta["out_H"], meta["out_W"], meta["out_C"]

    @jax.jit
    def forward(ops, x_nchw):
        n, c, h, w = x_nchw.shape
        x2d = jnp.transpose(x_nchw, (0, 2, 3, 1)).reshape(n * h, w * c)
        out = call(x2d, *ops)                    # [N*Ho, 128] lane-dense slab
        out = out[:, :Wo * Co]                   # drop lane padding
        return out.reshape(n, Ho, Wo, Co).transpose(0, 3, 1, 2)   # NCHW

    return forward


# ---------------------------------------------------------------------------
# Parameters + pure-XLA reference (for the correctness check)
# ---------------------------------------------------------------------------
def init_params(key):
    ks = jax.random.split(key, 10)

    def u(k, shape, fan_in):
        bound = 1.0 / jnp.sqrt(jnp.float32(fan_in))
        return jax.random.uniform(k, shape, jnp.float32, -bound, bound)

    return {
        "enc1_w": u(ks[0], (16, 1, 3, 3), 1 * 9),  "enc1_b": u(ks[1], (16,), 1 * 9),
        "enc2_w": u(ks[2], (8, 16, 3, 3), 16 * 9), "enc2_b": u(ks[3], (8,), 16 * 9),
        "dec1_w": u(ks[4], (8, 8, 3, 3), 8 * 9),   "dec1_b": u(ks[5], (8,), 8 * 9),
        "dec2_w": u(ks[6], (8, 16, 3, 3), 8 * 9),  "dec2_b": u(ks[7], (16,), 8 * 9),
        "dec3_w": u(ks[8], (1, 16, 3, 3), 16 * 9), "dec3_b": u(ks[9], (1,), 16 * 9),
    }


@jax.jit
def _ref_forward(params, x):
    dn = ("NCHW", "OIHW", "NCHW")

    def conv(x, w, b, stride, pad):
        y = jax.lax.conv_general_dilated(
            x, w, (stride, stride), ((pad, pad), (pad, pad)), dimension_numbers=dn)
        return y + b.reshape(1, -1, 1, 1)

    def convT(x, w, b, stride, pad, out_pad):
        K = w.shape[-1]
        w_flip = jnp.transpose(w[:, :, ::-1, ::-1], (1, 0, 2, 3))
        lo, hi = K - 1 - pad, K - 1 - pad + out_pad
        y = jax.lax.conv_general_dilated(
            x, w_flip, (1, 1), ((lo, hi), (lo, hi)),
            lhs_dilation=(stride, stride), dimension_numbers=dn)
        return y + b.reshape(1, -1, 1, 1)

    y = jax.nn.relu(conv(x, params["enc1_w"], params["enc1_b"], 2, 1))
    y = jax.nn.relu(conv(y, params["enc2_w"], params["enc2_b"], 2, 1))
    y = jax.nn.relu(convT(y, params["dec1_w"], params["dec1_b"], 2, 1, 1))
    y = jax.nn.relu(convT(y, params["dec2_w"], params["dec2_b"], 2, 1, 1))
    return jax.nn.sigmoid(conv(y, params["dec3_w"], params["dec3_b"], 1, 1))


if __name__ == "__main__":
    key = jax.random.PRNGKey(0)
    pkey, xkey = jax.random.split(key)
    params = init_params(pkey)
    x = jax.random.uniform(xkey, (2, 1, 16, 16), jnp.float32)    # NCHW input

    ops, meta = precompute_kernel_params(params, N=2, H=16, W=16)  # one-time prep
    denoise_forward = make_denoise_forward(meta)
    y = denoise_forward(ops, x)
    jax.block_until_ready(y)

    assert y.shape == (2, 1, 16, 16), y.shape
    assert bool(jnp.all((y >= 0.0) & (y <= 1.0)))                # sigmoid range
    y_ref = _ref_forward(params, x)                              # pure-XLA reference
    err = float(jnp.max(jnp.abs(y - y_ref)))
    assert err < 1e-4, f"max |err| = {err}"
    print("KERNEL_OK")
</pallas_src>

<mosaic_0001>
module attributes {stable_mosaic.version = 11 : i64} {
  func.func @kernel(%arg0: memref<32x16xf32, #tpu.memory_space<vmem>>, %arg1: memref<528x384xf32, #tpu.memory_space<vmem>>, %arg2: memref<128x768xf32, #tpu.memory_space<vmem>>, %arg3: memref<312x32xf32, #tpu.memory_space<vmem>>, %arg4: memref<40x256xf32, #tpu.memory_space<vmem>>, %arg5: memref<32x128xf32, #tpu.memory_space<vmem>>) attributes {dimension_semantics = [], scalar_prefetch = 0 : i64, scratch_operands = 0 : i64, tpu.core_type = #tpu.core_type<tc>} {
    %c0 = arith.constant 0 : index
    %c0_0 = arith.constant 0 : index
    %0 = vector.load %arg0[%c0, %c0_0] : memref<32x16xf32, #tpu.memory_space<vmem>>, vector<32x16xf32>
    %c0_1 = arith.constant 0 : index
    %c0_2 = arith.constant 0 : index
    %1 = vector.load %arg1[%c0_1, %c0_2] : memref<528x384xf32, #tpu.memory_space<vmem>>, vector<16x384xf32>
    %cst = arith.constant dense<0.000000e+00> : vector<32x384xf32>
    %2 = tpu.matmul %0, %1, %cst {dimension_numbers = #tpu.dot_dimension_numbers<[1], [0], [0], [1], [0, 0, 1, 1], [], []>} : vector<32x16xf32>, vector<16x384xf32>, vector<32x384xf32> -> vector<32x384xf32>
    %c0_3 = arith.constant 0 : index
    %c0_4 = arith.constant 0 : index
    %3 = vector.load %arg4[%c0_3, %c0_4] : memref<40x256xf32, #tpu.memory_space<vmem>>, vector<1x128xf32>
    %c0_5 = arith.constant 0 : index
    %c0_6 = arith.constant 0 : index
    %4 = vector.load %arg3[%c0_5, %c0_6] : memref<312x32xf32, #tpu.memory_space<vmem>>, vector<16x32xf32>
    %5 = vector.extract_strided_slice %2 {offsets = [0, 0], sizes = [32, 128], strides = [1, 1]} : vector<32x384xf32> to vector<32x128xf32>
    %cst_7 = arith.constant dense<0.000000e+00> : vector<16x128xf32>
    %6 = tpu.matmul %4, %5, %cst_7 {dimension_numbers = #tpu.dot_dimension_numbers<[1], [0], [0], [1], [0, 0, 1, 1], [], []>} : vector<16x32xf32>, vector<32x128xf32>, vector<16x128xf32> -> vector<16x128xf32>
    %7 = vector.broadcast %3 : vector<1x128xf32> to vector<16x128xf32>
    %8 = arith.addf %7, %6 : vector<16x128xf32>
    %c16 = arith.constant 16 : index
    %c0_8 = arith.constant 0 : index
    %9 = vector.load %arg3[%c16, %c0_8] : memref<312x32xf32, #tpu.memory_space<vmem>>, vector<16x32xf32>
    %10 = vector.extract_strided_slice %2 {offsets = [0, 128], sizes = [32, 128], strides = [1, 1]} : vector<32x384xf32> to vector<32x128xf32>
    %cst_9 = arith.constant dense<0.000000e+00> : vector<16x128xf32>
    %11 = tpu.matmul %9, %10, %cst_9 {dimension_numbers = #tpu.dot_dimension_numbers<[1], [0], [0], [1], [0, 0, 1, 1], [], []>} : vector<16x32xf32>, vector<32x128xf32>, vector<16x128xf32> -> vector<16x128xf32>
    %12 = arith.addf %8, %11 : vector<16x128xf32>
    %c32 = arith.constant 32 : index
    %c0_10 = arith.constant 0 : index
    %13 = vector.load %arg3[%c32, %c0_10] : memref<312x32xf32, #tpu.memory_space<vmem>>, vector<16x32xf32>
    %14 = vector.extract_strided_slice %2 {offsets = [0, 256], sizes = [32, 128], strides = [1, 1]} : vector<32x384xf32> to vector<32x128xf32>
    %cst_11 = arith.constant dense<0.000000e+00> : vector<16x128xf32>
    %15 = tpu.matmul %13, %14, %cst_11 {dimension_numbers = #tpu.dot_dimension_numbers<[1], [0], [0], [1], [0, 0, 1, 1], [], []>} : vector<16x32xf32>, vector<32x128xf32>, vector<16x128xf32> -> vector<16x128xf32>
    %16 = arith.addf %12, %15 : vector<16x128xf32>
    %cst_12 = arith.constant 0.000000e+00 : f32
    %17 = vector.broadcast %cst_12 : f32 to vector<16x128xf32>
    %18 = arith.maximumf %16, %17 : vector<16x128xf32>
    %c16_13 = arith.constant 16 : index
    %c0_14 = arith.constant 0 : index
    %19 = vector.load %arg1[%c16_13, %c0_14] : memref<528x384xf32, #tpu.memory_space<vmem>>, vector<128x384xf32>
    %cst_15 = arith.constant dense<0.000000e+00> : vector<16x384xf32>
    %20 = tpu.matmul %18, %19, %cst_15 {dimension_numbers = #tpu.dot_dimension_numbers<[1], [0], [0], [1], [0, 0, 1, 1], [], []>} : vector<16x128xf32>, vector<128x384xf32>, vector<16x384xf32> -> vector<16x384xf32>
    %c8 = arith.constant 8 : index
    %c0_16 = arith.constant 0 : index
    %21 = vector.load %arg4[%c8, %c0_16] : memref<40x256xf32, #tpu.memory_space<vmem>>, vector<1x128xf32>
    %c48 = arith.constant 48 : index
    %c0_17 = arith.constant 0 : index
    %22 = vector.load %arg3[%c48, %c0_17] : memref<312x32xf32, #tpu.memory_space<vmem>>, vector<8x16xf32>
    %23 = vector.extract_strided_slice %20 {offsets = [0, 0], sizes = [16, 128], strides = [1, 1]} : vector<16x384xf32> to vector<16x128xf32>
    %cst_18 = arith.constant dense<0.000000e+00> : vector<8x128xf32>
    %24 = tpu.matmul %22, %23, %cst_18 {dimension_numbers = #tpu.dot_dimension_numbers<[1], [0], [0], [1], [0, 0, 1, 1], [], []>} : vector<8x16xf32>, vector<16x128xf32>, vector<8x128xf32> -> vector<8x128xf32>
    %25 = vector.broadcast %21 : vector<1x128xf32> to vector<8x128xf32>
    %26 = arith.addf %25, %24 : vector<8x128xf32>
    %c56 = arith.constant 56 : index
    %c0_19 = arith.constant 0 : index
    %27 = vector.load %arg3[%c56, %c0_19] : memref<312x32xf32, #tpu.memory_space<vmem>>, vector<8x16xf32>
    %28 = vector.extract_strided_slice %20 {offsets = [0, 128], sizes = [16, 128], strides = [1, 1]} : vector<16x384xf32> to vector<16x128xf32>
    %cst_20 = arith.constant dense<0.000000e+00> : vector<8x128xf32>
    %29 = tpu.matmul %27, %28, %cst_20 {dimension_numbers = #tpu.dot_dimension_numbers<[1], [0], [0], [1], [0, 0, 1, 1], [], []>} : vector<8x16xf32>, vector<16x128xf32>, vector<8x128xf32> -> vector<8x128xf32>
    %30 = arith.addf %26, %29 : vector<8x128xf32>
    %c64 = arith.constant 64 : index
    %c0_21 = arith.constant 0 : index
    %31 = vector.load %arg3[%c64, %c0_21] : memref<312x32xf32, #tpu.memory_space<vmem>>, vector<8x16xf32>
    %32 = vector.extract_strided_slice %20 {offsets = [0, 256], sizes = [16, 128], strides = [1, 1]} : vector<16x384xf32> to vector<16x128xf32>
    %cst_22 = arith.constant dense<0.000000e+00> : vector<8x128xf32>
    %33 = tpu.matmul %31, %32, %cst_22 {dimension_numbers = #tpu.dot_dimension_numbers<[1], [0], [0], [1], [0, 0, 1, 1], [], []>} : vector<8x16xf32>, vector<16x128xf32>, vector<8x128xf32> -> vector<8x128xf32>
    %34 = arith.addf %30, %33 : vector<8x128xf32>
    %cst_23 = arith.constant 0.000000e+00 : f32
    %35 = vector.broadcast %cst_23 : f32 to vector<8x128xf32>
    %36 = arith.maximumf %34, %35 : vector<8x128xf32>
    %c144 = arith.constant 144 : index
    %c0_24 = arith.constant 0 : index
    %37 = vector.load %arg1[%c144, %c0_24] : memref<528x384xf32, #tpu.memory_space<vmem>>, vector<128x384xf32>
    %cst_25 = arith.constant dense<0.000000e+00> : vector<8x384xf32>
    %38 = tpu.matmul %36, %37, %cst_25 {dimension_numbers = #tpu.dot_dimension_numbers<[1], [0], [0], [1], [0, 0, 1, 1], [], []>} : vector<8x128xf32>, vector<128x384xf32>, vector<8x384xf32> -> vector<8x384xf32>
    %c16_26 = arith.constant 16 : index
    %c0_27 = arith.constant 0 : index
    %39 = vector.load %arg4[%c16_26, %c0_27] : memref<40x256xf32, #tpu.memory_space<vmem>>, vector<1x128xf32>
    %c72 = arith.constant 72 : index
    %c0_28 = arith.constant 0 : index
    %40 = vector.load %arg3[%c72, %c0_28] : memref<312x32xf32, #tpu.memory_space<vmem>>, vector<16x8xf32>
    %41 = vector.extract_strided_slice %38 {offsets = [0, 0], sizes = [8, 128], strides = [1, 1]} : vector<8x384xf32> to vector<8x128xf32>
    %cst_29 = arith.constant dense<0.000000e+00> : vector<16x128xf32>
    %42 = tpu.matmul %40, %41, %cst_29 {dimension_numbers = #tpu.dot_dimension_numbers<[1], [0], [0], [1], [0, 0, 1, 1], [], []>} : vector<16x8xf32>, vector<8x128xf32>, vector<16x128xf32> -> vector<16x128xf32>
    %43 = vector.broadcast %39 : vector<1x128xf32> to vector<16x128xf32>
    %44 = arith.addf %43, %42 : vector<16x128xf32>
    %c88 = arith.constant 88 : index
    %c0_30 = arith.constant 0 : index
    %45 = vector.load %arg3[%c88, %c0_30] : memref<312x32xf32, #tpu.memory_space<vmem>>, vector<16x8xf32>
    %46 = vector.extract_strided_slice %38 {offsets = [0, 128], sizes = [8, 128], strides = [1, 1]} : vector<8x384xf32> to vector<8x128xf32>
    %cst_31 = arith.constant dense<0.000000e+00> : vector<16x128xf32>
    %47 = tpu.matmul %45, %46, %cst_31 {dimension_numbers = #tpu.dot_dimension_numbers<[1], [0], [0], [1], [0, 0, 1, 1], [], []>} : vector<16x8xf32>, vector<8x128xf32>, vector<16x128xf32> -> vector<16x128xf32>
    %48 = arith.addf %44, %47 : vector<16x128xf32>
    %c104 = arith.constant 104 : index
    %c0_32 = arith.constant 0 : index
    %49 = vector.load %arg3[%c104, %c0_32] : memref<312x32xf32, #tpu.memory_space<vmem>>, vector<16x8xf32>
    %50 = vector.extract_strided_slice %38 {offsets = [0, 256], sizes = [8, 128], strides = [1, 1]} : vector<8x384xf32> to vector<8x128xf32>
    %cst_33 = arith.constant dense<0.000000e+00> : vector<16x128xf32>
    %51 = tpu.matmul %49, %50, %cst_33 {dimension_numbers = #tpu.dot_dimension_numbers<[1], [0], [0], [1], [0, 0, 1, 1], [], []>} : vector<16x8xf32>, vector<8x128xf32>, vector<16x128xf32> -> vector<16x128xf32>
    %52 = arith.addf %48, %51 : vector<16x128xf32>
    %cst_34 = arith.constant 0.000000e+00 : f32
    %53 = vector.broadcast %cst_34 : f32 to vector<16x128xf32>
    %54 = arith.maximumf %52, %53 : vector<16x128xf32>
    %c0_35 = arith.constant 0 : index
    %c0_36 = arith.constant 0 : index
    %55 = vector.load %arg2[%c0_35, %c0_36] : memref<128x768xf32, #tpu.memory_space<vmem>>, vector<128x768xf32>
    %cst_37 = arith.constant dense<0.000000e+00> : vector<16x768xf32>
    %56 = tpu.matmul %54, %55, %cst_37 {dimension_numbers = #tpu.dot_dimension_numbers<[1], [0], [0], [1], [0, 0, 1, 1], [], []>} : vector<16x128xf32>, vector<128x768xf32>, vector<16x768xf32> -> vector<16x768xf32>
    %c24 = arith.constant 24 : index
    %c0_38 = arith.constant 0 : index
    %57 = vector.load %arg4[%c24, %c0_38] : memref<40x256xf32, #tpu.memory_space<vmem>>, vector<1x256xf32>
    %c120 = arith.constant 120 : index
    %c0_39 = arith.constant 0 : index
    %58 = vector.load %arg3[%c120, %c0_39] : memref<312x32xf32, #tpu.memory_space<vmem>>, vector<32x16xf32>
    %59 = vector.extract_strided_slice %56 {offsets = [0, 0], sizes = [16, 256], strides = [1, 1]} : vector<16x768xf32> to vector<16x256xf32>
    %cst_40 = arith.constant dense<0.000000e+00> : vector<32x256xf32>
    %60 = tpu.matmul %58, %59, %cst_40 {dimension_numbers = #tpu.dot_dimension_numbers<[1], [0], [0], [1], [0, 0, 1, 1], [], []>} : vector<32x16xf32>, vector<16x256xf32>, vector<32x256xf32> -> vector<32x256xf32>
    %61 = vector.broadcast %57 : vector<1x256xf32> to vector<32x256xf32>
    %62 = arith.addf %61, %60 : vector<32x256xf32>
    %c152 = arith.constant 152 : index
    %c0_41 = arith.constant 0 : index
    %63 = vector.load %arg3[%c152, %c0_41] : memref<312x32xf32, #tpu.memory_space<vmem>>, vector<32x16xf32>
    %64 = vector.extract_strided_slice %56 {offsets = [0, 256], sizes = [16, 256], strides = [1, 1]} : vector<16x768xf32> to vector<16x256xf32>
    %cst_42 = arith.constant dense<0.000000e+00> : vector<32x256xf32>
    %65 = tpu.matmul %63, %64, %cst_42 {dimension_numbers = #tpu.dot_dimension_numbers<[1], [0], [0], [1], [0, 0, 1, 1], [], []>} : vector<32x16xf32>, vector<16x256xf32>, vector<32x256xf32> -> vector<32x256xf32>
    %66 = arith.addf %62, %65 : vector<32x256xf32>
    %c184 = arith.constant 184 : index
    %c0_43 = arith.constant 0 : index
    %67 = vector.load %arg3[%c184, %c0_43] : memref<312x32xf32, #tpu.memory_space<vmem>>, vector<32x16xf32>
    %68 = vector.extract_strided_slice %56 {offsets = [0, 512], sizes = [16, 256], strides = [1, 1]} : vector<16x768xf32> to vector<16x256xf32>
    %cst_44 = arith.constant dense<0.000000e+00> : vector<32x256xf32>
    %69 = tpu.matmul %67, %68, %cst_44 {dimension_numbers = #tpu.dot_dimension_numbers<[1], [0], [0], [1], [0, 0, 1, 1], [], []>} : vector<32x16xf32>, vector<16x256xf32>, vector<32x256xf32> -> vector<32x256xf32>
    %70 = arith.addf %66, %69 : vector<32x256xf32>
    %cst_45 = arith.constant 0.000000e+00 : f32
    %71 = vector.broadcast %cst_45 : f32 to vector<32x256xf32>
    %72 = arith.maximumf %70, %71 : vector<32x256xf32>
    %c272 = arith.constant 272 : index
    %c0_46 = arith.constant 0 : index
    %73 = vector.load %arg1[%c272, %c0_46] : memref<528x384xf32, #tpu.memory_space<vmem>>, vector<256x384xf32>
    %cst_47 = arith.constant dense<0.000000e+00> : vector<32x384xf32>
    %74 = tpu.matmul %72, %73, %cst_47 {dimension_numbers = #tpu.dot_dimension_numbers<[1], [0], [0], [1], [0, 0, 1, 1], [], []>} : vector<32x256xf32>, vector<256x384xf32>, vector<32x384xf32> -> vector<32x384xf32>
    %c32_48 = arith.constant 32 : index
    %c0_49 = arith.constant 0 : index
    %75 = vector.load %arg4[%c32_48, %c0_49] : memref<40x256xf32, #tpu.memory_space<vmem>>, vector<1x128xf32>
    %c216 = arith.constant 216 : index
    %c0_50 = arith.constant 0 : index
    %76 = vector.load %arg3[%c216, %c0_50] : memref<312x32xf32, #tpu.memory_space<vmem>>, vector<32x32xf32>
    %77 = vector.extract_strided_slice %74 {offsets = [0, 0], sizes = [32, 128], strides = [1, 1]} : vector<32x384xf32> to vector<32x128xf32>
    %cst_51 = arith.constant dense<0.000000e+00> : vector<32x128xf32>
    %78 = tpu.matmul %76, %77, %cst_51 {dimension_numbers = #tpu.dot_dimension_numbers<[1], [0], [0], [1], [0, 0, 1, 1], [], []>} : vector<32x32xf32>, vector<32x128xf32>, vector<32x128xf32> -> vector<32x128xf32>
    %79 = vector.broadcast %75 : vector<1x128xf32> to vector<32x128xf32>
    %80 = arith.addf %79, %78 : vector<32x128xf32>
    %c248 = arith.constant 248 : index
    %c0_52 = arith.constant 0 : index
    %81 = vector.load %arg3[%c248, %c0_52] : memref<312x32xf32, #tpu.memory_space<vmem>>, vector<32x32xf32>
    %82 = vector.extract_strided_slice %74 {offsets = [0, 128], sizes = [32, 128], strides = [1, 1]} : vector<32x384xf32> to vector<32x128xf32>
    %cst_53 = arith.constant dense<0.000000e+00> : vector<32x128xf32>
    %83 = tpu.matmul %81, %82, %cst_53 {dimension_numbers = #tpu.dot_dimension_numbers<[1], [0], [0], [1], [0, 0, 1, 1], [], []>} : vector<32x32xf32>, vector<32x128xf32>, vector<32x128xf32> -> vector<32x128xf32>
    %84 = arith.addf %80, %83 : vector<32x128xf32>
    %c280 = arith.constant 280 : index
    %c0_54 = arith.constant 0 : index
    %85 = vector.load %arg3[%c280, %c0_54] : memref<312x32xf32, #tpu.memory_space<vmem>>, vector<32x32xf32>
    %86 = vector.extract_strided_slice %74 {offsets = [0, 256], sizes = [32, 128], strides = [1, 1]} : vector<32x384xf32> to vector<32x128xf32>
    %cst_55 = arith.constant dense<0.000000e+00> : vector<32x128xf32>
    %87 = tpu.matmul %85, %86, %cst_55 {dimension_numbers = #tpu.dot_dimension_numbers<[1], [0], [0], [1], [0, 0, 1, 1], [], []>} : vector<32x32xf32>, vector<32x128xf32>, vector<32x128xf32> -> vector<32x128xf32>
    %88 = arith.addf %84, %87 : vector<32x128xf32>
    %cst_56 = arith.constant 0.000000e+00 : f32
    %89 = vector.broadcast %cst_56 : f32 to vector<32x128xf32>
    %90 = arith.subf %89, %88 : vector<32x128xf32>
    %91 = math.exp %90 : vector<32x128xf32>
    %cst_57 = arith.constant 1.000000e+00 : f32
    %92 = vector.broadcast %cst_57 : f32 to vector<32x128xf32>
    %93 = arith.addf %92, %91 : vector<32x128xf32>
    %cst_58 = arith.constant 1.000000e+00 : f32
    %94 = vector.broadcast %cst_58 : f32 to vector<32x128xf32>
    %95 = arith.divf %94, %93 : vector<32x128xf32>
    %c0_59 = arith.constant 0 : index
    %c0_60 = arith.constant 0 : index
    %96 = vector.load %arg5[%c0_59, %c0_60] : memref<32x128xf32, #tpu.memory_space<vmem>>, vector<32x128xf32>
    tpu.vector_store %arg5[%c0_59, %c0_60], %95 {strides = array<i32>} : memref<32x128xf32, #tpu.memory_space<vmem>>, vector<32x128xf32>,
    return
  }
}

</mosaic_0001>

<bundles_post_ra>
// kernel: forward.1
= control target key start
LH: loop header
LB: loop body
LE: loop exit
PB: predicated region body
PF: predicated region fallthrough
CT: control target
= control target key end

     0   :  { %10 = vsyncpa [#allocation3], 0  ;;  %s3932_s0 = inlined_call_operand.vmem [shape: f32[32,16], index: 0, kind: input, shape index: {}]   ;;  %s3933_s1 = inlined_call_operand.hbm [shape: f32[528,384], index: 1, kind: input, shape index: {}]   ;;  %s3934_s2 = inlined_call_operand.hbm [shape: f32[128,768], index: 2, kind: input, shape index: {}]   ;;  %s3935_s3 = inlined_call_operand.vmem [shape: f32[312,32], index: 3, kind: input, shape index: {}]   ;;  %s3936_s4 = inlined_call_operand.vmem [shape: f32[40,256], index: 4, kind: input, shape index: {}]   ;;  %s3937_s5 = inlined_call_operand.hbm [shape: f32[32,128], index: 5, kind: output, shape index: {}]  }
   0x1   :  { %11 = vsyncpa [#allocation6], 0 }
   0x2   :  { %12 = vsyncpa [#allocation4], 0  ;;  %s3625_s18 = smov [#allocation2]   ;;  %s3553_s22 = scalar_lea.hbm %s3933_s1, 25344 }
   0x3   :  { %s20_s19 = sshll.u32 %s3625_s18, 4  ;;  %p3554_p0 = scmp.ne.s32.totalorder %s3933_s1, %s3553_s22  ;;  %s21_s19 = int_to_ptr.vmem [resolvable:$true] %s20_s19 }
   0x4   :  { %p3557_p1 = scmp.lt.u32.totalorder %s3553_s22, %s3933_s1 }
   0x6   :  { %p3559_p2 = pnand %p3557_p1, %p3554_p0 }
   0x8   :  { %3562 = shalt.err (!%p3559_p2)
}
   0x9   :  { %s3563_s27 = scalar_lea.vmem %s21_s19, 25344  ;;  %p3568_p4 = scmp.lt.s32.totalorder %s21_s19, %s21_s19 }
   0xa   :  { %p3564_p3 = scmp.ne.s32.totalorder %s21_s19, %s3563_s27  ;;  %p3569_p5 = scmp.lt.s32.totalorder %s3563_s27, %s3563_s27 }
   0xc   :  { %p3570_p6 = por %p3569_p5, %p3568_p4 }
   0xe   :  { %p3571_p7 = pnand %p3570_p6, %p3564_p3 }
  0x10   :  { %3574 = shalt.err (!%p3571_p7)
}
  0x11   :  { %s3626_s28 = smov 384   ;;  %s3627_s29 = smov 24  }
  0x12   :  { %26 = dma.hbm_to_vmem [thread:$0]  %s3933_s1, 25344, %s21_s19, [#allocation3], %s3626_s28, %s3626_s28, %s3627_s29  }
  0x13   :  { %s3628_s7 = smov [#allocation5]   ;;  %s3575_s11 = scalar_lea.hbm %s3934_s2, 12288 }
  0x14   :  { %s32_s8 = sshll.u32 %s3628_s7, 4  ;;  %p3576_p8 = scmp.ne.s32.totalorder %s3934_s2, %s3575_s11  ;;  %s33_s8 = int_to_ptr.vmem [resolvable:$true] %s32_s8 }
  0x15   :  { %p3579_p9 = scmp.lt.u32.totalorder %s3575_s11, %s3934_s2 }
  0x17   :  { %p3581_p10 = pnand %p3579_p9, %p3576_p8 }
  0x19   :  { %3584 = shalt.err (!%p3581_p10)
}
  0x1a   :  { %s3585_s16 = scalar_lea.vmem %s33_s8, 12288  ;;  %p3590_p12 = scmp.lt.s32.totalorder %s33_s8, %s33_s8 }
  0x1b   :  { %p3586_p11 = scmp.ne.s32.totalorder %s33_s8, %s3585_s16  ;;  %p3591_p13 = scmp.lt.s32.totalorder %s3585_s16, %s3585_s16 }
  0x1d   :  { %p3592_p0 = por %p3591_p13, %p3590_p12 }
  0x1f   :  { %p3593_p1 = pnand %p3592_p0, %p3586_p11 }
  0x21   :  { %3596 = shalt.err (!%p3593_p1)
}
  0x22   :  { %s3629_s1 = smov 768   ;;  %s3630_s17 = smov 48  }
  0x23   :  { %38 = dma.hbm_to_vmem [thread:$0]  %s3934_s2, 12288, %s33_s8, [#allocation6], %s3629_s1, %s3629_s1, %s3630_s17  }
  0x24   :  { %3619 = dma.done.wait [#allocation3], 25344  }
  0x25   :  { %3620 = vsyncadd [#allocation3], 4294941952 }
  0x26   :  { %3621 = dma.done.wait [#allocation6], 12288  }
  0x27   :  { %3622 = vsyncadd [#allocation6], 4294955008  ;;  %v3631_v0 = vmov 0.0   ;;  %v54_v1 = vld [vmem:[#allocation2 + $0x8] sm:$0xff]  ;;  %v57_v2 = vld [vmem:[#allocation2 + $0x20] sm:$0xff]  ;;  %vm59_vm0 = vcmask 130048  }
  0x28   :  { %136 = vmatprep.mubr.f32.mxu0 %v3631_v0  ;;  %v53_v3 = vld [vmem:[#allocation2] sm:$0xff]  ;;  %v3083_v4 = vpack.c.bf16 %v57_v2, %v54_v1  ;;  %v56_v5 = vld [vmem:[#allocation2 + $0x18] sm:$0xff]  ;;  %v55_v8 = vld [vmem:[#allocation2 + $0x10] sm:$0xff]  ;;  %vm249_vm1 = vcmask 261120   ;;  %vm3633_vm2 = vmmov 0   ;;  %vm1124_vm3 = vcmask 64512  }
  0x29   :  { %v49_v6 = vld [vmem:[%s3932_s0] sm:$0xff]  ;;  %v3085_v7 = vpack.c.bf16 %v56_v5, %v53_v3  ;;  %v58_v9 = vld [vmem:[#allocation2 + $0x28] sm:$0xff]  ;;  %v51_v12 = vld [vmem:[%s3932_s0 + $0x10] sm:$0xff] }
  0x2a   :  { %2896 = vmatprep.mubr.msk.f32.mxu1 %vm59_vm0, %v49_v6  ;;  %3084 = vmatprep.subr.bf16.mxu0 %v3083_v4  ;;  %v3087_v10 = vpack.c.bf16 %v58_v9, %v55_v8  ;;  %v50_v11 = vld [vmem:[%s3932_s0 + $0x8] sm:$0xff]  ;;  %v52_v13 = vld [vmem:[%s3932_s0 + $0x18] sm:$0xff]  ;;  %v247_v14 = vld [vmem:[%s3935_s3] sm:$0xff] }
  0x2b   :  { %3086 = vmatpush1.bf16.msra.mxu0 %v3085_v7  ;;  %v506_v15 = vld [vmem:[#allocation2 + $0x38] sm:$0xff]  ;;  %v509_v16 = vld [vmem:[#allocation2 + $0x50] sm:$0xff]  ;;  %v508_v19 = vld [vmem:[#allocation2 + $0x48] sm:$0xff] }
  0x2c   :  { %3088 = vmatprep.subr.bf16.mxu1 %v3087_v10  ;;  %v505_v17 = vld [vmem:[#allocation2 + $0x30] sm:$0xff]  ;;  %v3115_v18 = vpack.c.bf16 %v509_v16, %v506_v15  ;;  %v512_v21 = vld [vmem:[#allocation2 + $0x68] sm:$0xff]  ;;  %v515_v22 = vld [vmem:[#allocation2 + $0x80] sm:$0xff] }
  0x2d   :  { %3090 = vmatpush3.bf16.msra.mxu1 %v3087_v10  ;;  %v3117_v20 = vpack.c.bf16 %v508_v19, %v505_v17  ;;  %v511_v23 = vld [vmem:[#allocation2 + $0x60] sm:$0xff]  ;;  %v3119_v24 = vpack.c.bf16 %v515_v22, %v512_v21  ;;  %v514_v25 = vld [vmem:[#allocation2 + $0x78] sm:$0xff]  ;;  %v521_v28 = vld [vmem:[#allocation2 + $0xb0] sm:$0xff] }
  0x2e   :  { %2699 = vmatmul.mubr.msk.f32.vlgmr.msra.gmra.mrb[0].mxu0 %vm59_vm0, %v49_v6  ;;  %3116 = vmatprep.subr.bf16.mxu0 %v3115_v18  ;;  %v3121_v26 = vpack.c.bf16 %v514_v25, %v511_v23  ;;  %v518_v27 = vld [vmem:[#allocation2 + $0x98] sm:$0xff]  ;;  %v517_v29 = vld [vmem:[#allocation2 + $0x90] sm:$0xff]  ;;  %v520_v31 = vld [vmem:[#allocation2 + $0xa8] sm:$0xff] }
  0x2f   :  { %142 = vmatprep.mubr.f32.mxu0 %v3631_v0  ;;  %3118 = vmatpush1.bf16.msra.mxu0 %v3117_v20  ;;  %v3123_v30 = vpack.c.bf16 %v521_v28, %v518_v27  ;;  %v3125_v32 = vpack.c.bf16 %v520_v31, %v517_v29  ;;  %v524_v33 = vld [vmem:[#allocation2 + $0xc8] sm:$0xff]  ;;  %v527_v34 = vld [vmem:[#allocation2 + $0xe0] sm:$0xff]  ;;  %v526_v37 = vld [vmem:[#allocation2 + $0xd8] sm:$0xff] }
  0x30   :  { %2897 = vmatmul.mubr.msk.f32.vlgmr.msra.gmra.mrb[0].mxu1 %vm59_vm0, %v50_v11  ;;  %3120 = vmatprep.subr.bf16.mxu0 %v3119_v24  ;;  %v523_v35 = vld [vmem:[#allocation2 + $0xc0] sm:$0xff]  ;;  %v3127_v36 = vpack.c.bf16 %v527_v34, %v524_v33  ;;  %v530_v39 = vld [vmem:[#allocation2 + $0xf8] sm:$0xff]  ;;  %v533_v40 = vld [vmem:[#allocation2 + $0x110] sm:$0xff] }
  0x31   :  { %2899 = vmatprep.mubr.msk.f32.mxu1 %vm59_vm0, %v51_v12  ;;  %v3129_v38 = vpack.c.bf16 %v526_v37, %v523_v35  ;;  %v529_v41 = vld [vmem:[#allocation2 + $0xf0] sm:$0xff]  ;;  %v3131_v42 = vpack.c.bf16 %v533_v40, %v530_v39  ;;  %v532_v43 = vld [vmem:[#allocation2 + $0x108] sm:$0xff]  ;;  %v539_v46 = vld [vmem:[#allocation2 + $0x140] sm:$0xff] }
  0x32   :  { %2700 = vmatmul.mubr.msk.f32.gmra.mrb[2].mxu0 %vm59_vm0, %v50_v11  ;;  %v3133_v44 = vpack.c.bf16 %v532_v43, %v529_v41  ;;  %v536_v45 = vld [vmem:[#allocation2 + $0x128] sm:$0xff]  ;;  %v535_v47 = vld [vmem:[#allocation2 + $0x120] sm:$0xff]  ;;  %v538_v49 = vld [vmem:[#allocation2 + $0x138] sm:$0xff] }
  0x33   :  { %148 = vmatprep.mubr.f32.mxu0 %v3631_v0  ;;  %3122 = vmatpush1.bf16.msra.mxu0 %v3121_v26  ;;  %v3135_v48 = vpack.c.bf16 %v539_v46, %v536_v45  ;;  %v3137_v50 = vpack.c.bf16 %v538_v49, %v535_v47  ;;  %v542_v51 = vld [vmem:[#allocation2 + $0x158] sm:$0xff]  ;;  %v545_v52 = vld [vmem:[#allocation2 + $0x170] sm:$0xff]  ;;  %v544_v55 = vld [vmem:[#allocation2 + $0x168] sm:$0xff] }
  0x34   :  { %2900 = vmatmul.mubr.msk.f32.gmra.mrb[2].mxu1 %vm59_vm0, %v52_v13  ;;  %3124 = vmatprep.subr.bf16.mxu0 %v3123_v30  ;;  %v541_v53 = vld [vmem:[#allocation2 + $0x150] sm:$0xff]  ;;  %v3139_v54 = vpack.c.bf16 %v545_v52, %v542_v51  ;;  %v418_v15 = vld [vmem:[%s3935_s3 + $0x20] sm:$0xff]  ;;  %v510_v17 = vld [vmem:[#allocation2 + $0x58] sm:$0xff] }
  0x35   :  { %2910 = vmatprep.mubr.msk.f32.mxu1 %vm249_vm1, %v247_v14  ;;  %v3141_v56 = vpack.c.bf16 %v544_v55, %v541_v53  ;;  %v334_v14 = vld [vmem:[%s3935_s3 + $0x18] sm:$0xff]  ;;  %v507_v16 = vld [vmem:[#allocation2 + $0x40] sm:$0xff]  ;;  %v513_v19 = vld [vmem:[#allocation2 + $0x70] sm:$0xff] }
  0x36   :  { %2701 = vmatmul.mubr.msk.f32.gmra.mrb[4].mxu0 %vm59_vm0, %v51_v12  ;;  %v248_v12 = vld [vmem:[%s3935_s3 + $0x8] sm:$0xff]  ;;  %v3147_v18 = vpack.c.bf16 %v510_v17, %v507_v16  ;;  %v519_v23 = vld [vmem:[#allocation2 + $0xa0] sm:$0xff]  ;;  %v522_v24 = vld [vmem:[#allocation2 + $0xb8] sm:$0xff] }
  0x37   :  { %154 = vmatprep.mubr.f32.mxu0 %v3631_v0  ;;  %3126 = vmatpush1.bf16.msra.mxu0 %v3125_v32  ;;  %v516_v20 = vld [vmem:[#allocation2 + $0x88] sm:$0xff]  ;;  %v3155_v25 = vpack.c.bf16 %v522_v24, %v519_v23  ;;  %v525_v26 = vld [vmem:[#allocation2 + $0xd0] sm:$0xff]  ;;  %v531_v29 = vld [vmem:[#allocation2 + $0x100] sm:$0xff] }
  0x38   :  { %3128 = vmatprep.subr.bf16.mxu0 %v3127_v36  ;;  %v419_v21 = vld [vmem:[%s3935_s3 + $0x28] sm:$0xff]  ;;  %v3151_v22 = vpack.c.bf16 %v516_v20, %v513_v19  ;;  %v534_v30 = vld [vmem:[#allocation2 + $0x118] sm:$0xff]  ;;  %v537_v32 = vld [vmem:[#allocation2 + $0x130] sm:$0xff] }
  0x39   :  { %v528_v27 = vld [vmem:[#allocation2 + $0xe8] sm:$0xff]  ;;  %v3163_v31 = vpack.c.bf16 %v534_v30, %v531_v29  ;;  %v543_v35 = vld [vmem:[#allocation2 + $0x160] sm:$0xff]  ;;  %v546_v36 = vld [vmem:[#allocation2 + $0x178] sm:$0xff] }
  0x3a   :  { %2702 = vmatmul.mubr.msk.f32.gmra.mrb[6].mxu0 %vm59_vm0, %v52_v13  ;;  %v333_v13 = vld [vmem:[%s3935_s3 + $0x10] sm:$0xff]  ;;  %v3159_v28 = vpack.c.bf16 %v528_v27, %v525_v26  ;;  %v540_v33 = vld [vmem:[#allocation2 + $0x148] sm:$0xff]  ;;  %v3171_v37 = vpack.c.bf16 %v546_v36, %v543_v35  ;;  %v551_v39 = vld [vmem:[#allocation2 + $0x1a0] sm:$0xff] }
  0x3b   :  { %617 = vmatprep.mubr.f32.mxu0 %v3631_v0  ;;  %3130 = vmatpush1.bf16.msra.mxu0 %v3129_v38  ;;  %v3167_v34 = vpack.c.bf16 %v540_v33, %v537_v32  ;;  %v548_v38 = vld [vmem:[#allocation2 + $0x188] sm:$0xff]  ;;  %v547_v41 = vld [vmem:[#allocation2 + $0x180] sm:$0xff]  ;;  %v549_v43 = vld [vmem:[#allocation2 + $0x190] sm:$0xff] }
  0x3c   :  { %3132 = vmatprep.subr.bf16.mxu0 %v3131_v42  ;;  %v3143_v40 = vpack.c.bf16 %v551_v39, %v548_v38  ;;  %v550_v42 = vld [vmem:[#allocation2 + $0x198] sm:$0xff]  ;;  %v552_v45 = vld [vmem:[#allocation2 + $0x1a8] sm:$0xff]  ;;  %v246_v47 = vld [vmem:[%s3936_s4] ss:$0 sm:$0xff] }
  0x3d   :  { %v3175_v46 = vpack.c.bf16 %v552_v45, %v549_v43  ;;  %v934_v55 = vld [vmem:[#allocation2 + $0x1c0] sm:$0xff]  ;;  %v933_v23 = vld [vmem:[#allocation2 + $0x1b8] sm:$0xff]  ;;  %v936_v24 = vld [vmem:[#allocation2 + $0x1d0] sm:$0xff] }
  0x3e   :  { %v3188_v26 = vpack.c.bf16 %v936_v24, %v933_v23  ;;  %v932_v27 = vld [vmem:[#allocation2 + $0x1b0] sm:$0xff]  ;;  %v939_v29 = vld [vmem:[#allocation2 + $0x1e8] sm:$0xff]  ;;  %v942_v30 = vld [vmem:[#allocation2 + $0x200] sm:$0xff] }
  0x3f   :  { %3134 = vmatpush1.bf16.msra.mxu0 %v3133_v44  ;;  %v3145_v44 = vpack.c.bf16 %v550_v42, %v547_v41  ;;  %v3192_v33 = vpack.c.bf16 %v942_v30, %v939_v29  ;;  %v941_v35 = vld [vmem:[#allocation2 + $0x1f8] sm:$0xff]  ;;  %v947_v41 = vld [vmem:[#allocation2 + $0x228] sm:$0xff]  ;;  %v954_v43 = vld [vmem:[#allocation2 + $0x260] sm:$0xff] }
  0x40   :  { %3136 = vmatprep.subr.bf16.mxu0 %v3135_v48  ;;  %v945_v36 = vld [vmem:[#allocation2 + $0x218] sm:$0xff]  ;;  %v951_v42 = vld [vmem:[#allocation2 + $0x248] sm:$0xff]  ;;  %v1386_v23 = vld [vmem:[#allocation5 + $0x30] sm:$0xff] }
  0x41   :  { %v3200_v45 = vpack.c.bf16 %v954_v43, %v951_v42  ;;  %v1429_v43 = vld [vmem:[#allocation5 + $0x188] sm:$0xff] }
  0x43   :  { %3138 = vmatpush1.bf16.msra.mxu0 %v3137_v50 }
  0x44   :  { %3140 = vmatprep.subr.bf16.mxu0 %v3139_v54  ;;  %v3632_v54 = vmov 0.0|0.0  }
  0x47   :  { %3142 = vmatpush1.bf16.msra.mxu0 %v3141_v56  ;;  %v937_v56 = vld [vmem:[#allocation2 + $0x1d8] sm:$0xff] }
  0x48   :  { %3144 = vmatprep.subr.bf16.mxu0 %v3143_v40  ;;  %v944_v40 = vld [vmem:[#allocation2 + $0x210] sm:$0xff] }
  0x4b   :  { %3146 = vmatpush1.bf16.msra.mxu0 %v3145_v44  ;;  %v3198_v44 = vpack.c.bf16 %v947_v41, %v944_v40  ;;  %v1422_v41 = vld [vmem:[#allocation5 + $0x150] sm:$0xff] }
  0x4c   :  { %3179 = vmatprep.subr.bf16.mxu0 %v3632_v54 }
 0x101   :  { %v138_v57 = vpop.f32.mrb[0].mxu0 }
 0x102   :  { %v140_v58 = vpop.f32.mrb[1].mxu0 }
 0x103   :  { %v2898_v59 = vpop.f32.mrb[0].mxu1 }
 0x104   :  { %v227_v61 = vpop.f32.mrb[1].mxu1 }
 0x105   :  { %v144_v60 = vpop.f32.mrb[2].mxu0  ;;  %v3107_v1 = vpack.c.bf16 %v2898_v59, %v227_v61  ;;  %v943_v59 = vld [vmem:[#allocation2 + $0x208] sm:$0xff]  ;;  %v946_v61 = vld [vmem:[#allocation2 + $0x220] sm:$0xff] }
 0x106   :  { %v3091_v62 = vpack.c.bf16 %v144_v60, %v138_v57  ;;  %v146_v63 = vpop.f32.mrb[3].mxu0  ;;  %v3221_v57 = vpack.c.bf16 %v937_v56, %v934_v55  ;;  %v966_v55 = vld [vmem:[#allocation2 + $0x2c0] sm:$0xff] }
 0x107   :  { %v3099_v2 = vpack.c.bf16 %v146_v63, %v140_v58  ;;  %v2901_v3 = vpop.f32.mrb[2].mxu1  ;;  %v940_v58 = vld [vmem:[#allocation2 + $0x1f0] sm:$0xff] }
 0x108   :  { %3092 = vmatprep.subr.bf16.mxu1 %v3091_v62  ;;  %v237_v5 = vpop.f32.mrb[3].mxu1  ;;  %v3224_v60 = vpack.c.bf16 %v943_v59, %v940_v58  ;;  %v962_v58 = vld [vmem:[#allocation2 + $0x2a0] sm:$0xff]  ;;  %v965_v59 = vld [vmem:[#allocation2 + $0x2b8] sm:$0xff] }
 0x109   :  { %v150_v4 = vpop.f32.mrb[4].mxu0  ;;  %3094 = vmatpush3.bf16.msra.mxu1 %v3091_v62  ;;  %v3111_v7 = vpack.c.bf16 %v2901_v3, %v237_v5  ;;  %v949_v62 = vld [vmem:[#allocation2 + $0x238] sm:$0xff] }
 0x10a   :  { %v152_v6 = vpop.f32.mrb[5].mxu0  ;;  %v3227_v63 = vpack.c.bf16 %v949_v62, %v946_v61  ;;  %v961_v5 = vld [vmem:[#allocation2 + $0x298] sm:$0xff]  ;;  %v972_v61 = vld [vmem:[#allocation2 + $0x2f0] sm:$0xff]  ;;  %v3210_v62 = vpack.c.bf16 %v965_v59, %v962_v58  ;;  %v1458_v59 = vld [vmem:[#allocation5 + $0x270] sm:$0xff] }
 0x10d   :  { %v156_v8 = vpop.f32.mrb[6].mxu0 }
 0x10e   :  { %v3095_v9 = vpack.c.bf16 %v156_v8, %v150_v4  ;;  %v158_v10 = vpop.f32.mrb[7].mxu0  ;;  %v958_v4 = vld [vmem:[#allocation2 + $0x280] sm:$0xff]  ;;  %v967_v8 = vld [vmem:[#allocation2 + $0x2c8] sm:$0xff] }
 0x10f   :  { %v3103_v11 = vpack.c.bf16 %v158_v10, %v152_v6  ;;  %v3233_v6 = vpack.c.bf16 %v961_v5, %v958_v4  ;;  %v970_v10 = vld [vmem:[#allocation2 + $0x2e0] sm:$0xff]  ;;  %v975_v4 = vld [vmem:[#allocation2 + $0x308] sm:$0xff] }
 0x110   :  { %3096 = vmatprep.subr.bf16.mxu1 %v3095_v9  ;;  %v978_v5 = vld [vmem:[#allocation2 + $0x320] sm:$0xff] }
 0x111   :  { %3098 = vmatpush3.bf16.msra.mxu1 %v3095_v9 }
 0x112   :  { %3100 = vmatprep.subr.bf16.mxu1 %v3099_v2 }
 0x114   :  { %2911 = vmatmul.mubr.msk.f32.vlgmr.msra.gmra.mrb[4].mxu1 %vm249_vm1, %v248_v12 }
 0x115   :  { %3102 = vmatpush3.bf16.msra.mxu1 %v3099_v2  ;;  %2921 = vmatprep.mubr.msk.f32.mxu1 %vm249_vm1, %v333_v13  ;;  %v955_v2 = vld [vmem:[#allocation2 + $0x268] sm:$0xff] }
 0x116   :  { %3104 = vmatprep.subr.bf16.mxu1 %v3103_v11 }
 0x119   :  { %3106 = vmatpush3.bf16.msra.mxu1 %v3103_v11  ;;  %v973_v11 = vld [vmem:[#allocation2 + $0x2f8] sm:$0xff] }
 0x11a   :  { %3108 = vmatprep.subr.bf16.mxu1 %v3107_v1  ;;  %v3239_v12 = vpack.c.bf16 %v973_v11, %v970_v10  ;;  %v979_v11 = vld [vmem:[#allocation2 + $0x328] sm:$0xff] }
 0x11c   :  { %2922 = vmatmul.mubr.msk.f32.vlgmr.msra.gmra.mrb[4].mxu1 %vm249_vm1, %v334_v14 }
 0x11d   :  { %3110 = vmatpush3.bf16.msra.mxu1 %v3107_v1  ;;  %2932 = vmatprep.mubr.msk.f32.mxu1 %vm249_vm1, %v418_v15  ;;  %v952_v1 = vld [vmem:[#allocation2 + $0x250] sm:$0xff] }
 0x11e   :  { %3112 = vmatprep.subr.bf16.mxu1 %v3111_v7  ;;  %v3230_v3 = vpack.c.bf16 %v955_v2, %v952_v1  ;;  %v968_v1 = vld [vmem:[#allocation2 + $0x2d0] sm:$0xff]  ;;  %v971_v2 = vld [vmem:[#allocation2 + $0x2e8] sm:$0xff] }
 0x121   :  { %3114 = vmatpush3.bf16.msra.mxu1 %v3111_v7  ;;  %v964_v7 = vld [vmem:[#allocation2 + $0x2b0] sm:$0xff] }
 0x122   :  { %3148 = vmatprep.subr.bf16.mxu1 %v3147_v18  ;;  %v3236_v9 = vpack.c.bf16 %v967_v8, %v964_v7  ;;  %v974_v7 = vld [vmem:[#allocation2 + $0x300] sm:$0xff]  ;;  %v977_v8 = vld [vmem:[#allocation2 + $0x318] sm:$0xff] }
 0x123   :  { %v3218_v10 = vpack.c.bf16 %v977_v8, %v974_v7  ;;  %v1293_v7 = vld [vmem:[%s3935_s3 + $0x68] sm:$0xff] }
 0x124   :  { %2933 = vmatmul.mubr.msk.f32.vlgmr.msra.gmra.mrb[4].mxu1 %vm249_vm1, %v419_v21 }
 0x125   :  { %3150 = vmatpush3.bf16.msra.mxu1 %v3147_v18 }
 0x126   :  { %3152 = vmatprep.subr.bf16.mxu1 %v3151_v22 }
 0x129   :  { %3154 = vmatpush3.bf16.msra.mxu1 %v3151_v22  ;;  %v706_v22 = vld [vmem:[%s3935_s3 + $0x30] sm:$0xff] }
 0x12a   :  { %3156 = vmatprep.subr.bf16.mxu1 %v3155_v25 }
 0x12d   :  { %3158 = vmatpush3.bf16.msra.mxu1 %v3155_v25  ;;  %v781_v25 = vld [vmem:[%s3935_s3 + $0x38] sm:$0xff] }
 0x12e   :  { %3160 = vmatprep.subr.bf16.mxu1 %v3159_v28 }
 0x131   :  { %3162 = vmatpush3.bf16.msra.mxu1 %v3159_v28  ;;  %v935_v28 = vld [vmem:[#allocation2 + $0x1c8] sm:$0xff] }
 0x132   :  { %3164 = vmatprep.subr.bf16.mxu1 %v3163_v31  ;;  %v3190_v32 = vpack.c.bf16 %v935_v28, %v932_v27  ;;  %v1392_v27 = vld [vmem:[#allocation5 + $0x60] sm:$0xff]  ;;  %v1398_v28 = vld [vmem:[#allocation5 + $0x90] sm:$0xff] }
 0x133   :  { %v3250_v30 = vpack.c.bf16 %v1398_v28, %v1392_v27  ;;  %v1418_v28 = vld [vmem:[#allocation5 + $0x130] sm:$0xff] }
 0x135   :  { %3166 = vmatpush3.bf16.msra.mxu1 %v3163_v31  ;;  %v856_v31 = vld [vmem:[%s3935_s3 + $0x40] sm:$0xff] }
 0x136   :  { %3168 = vmatprep.subr.bf16.mxu1 %v3167_v34 }
 0x139   :  { %3170 = vmatpush3.bf16.msra.mxu1 %v3167_v34  ;;  %v938_v34 = vld [vmem:[#allocation2 + $0x1e0] sm:$0xff] }
 0x13a   :  { %3172 = vmatprep.subr.bf16.mxu1 %v3171_v37  ;;  %v3194_v38 = vpack.c.bf16 %v941_v35, %v938_v34  ;;  %v1404_v34 = vld [vmem:[#allocation5 + $0xc0] sm:$0xff]  ;;  %v1410_v35 = vld [vmem:[#allocation5 + $0xf0] sm:$0xff] }
 0x13d   :  { %3174 = vmatpush3.bf16.msra.mxu1 %v3171_v37  ;;  %v948_v37 = vld [vmem:[#allocation2 + $0x230] sm:$0xff] }
 0x13e   :  { %3176 = vmatprep.subr.bf16.mxu1 %v3175_v46  ;;  %v3196_v39 = vpack.c.bf16 %v948_v37, %v945_v36  ;;  %v3254_v36 = vpack.c.bf16 %v1410_v35, %v1404_v34  ;;  %v1417_v37 = vld [vmem:[#allocation5 + $0x128] sm:$0xff]  ;;  %v1430_v34 = vld [vmem:[#allocation5 + $0x190] sm:$0xff]  ;;  %v1436_v35 = vld [vmem:[#allocation5 + $0x1c0] sm:$0xff] }
 0x141   :  { %3178 = vmatpush3.bf16.msra.mxu1 %v3175_v46  ;;  %v950_v46 = vld [vmem:[#allocation2 + $0x240] sm:$0xff] }
 0x142   :  { %3220 = vmatprep.subr.bf16.mxu1 %v3632_v54 }
 0x1f7   :  { %v2934_v48 = vpop.f32.mrb[4].mxu1 }
 0x1f8   :  { %v3472_v49 = vadd.f32 %v2934_v48, %v246_v47  ;;  %v492_v50 = vpop.f32.mrb[5].mxu1  ;;  %v957_v48 = vld [vmem:[#allocation2 + $0x278] sm:$0xff] }
 0x1f9   :  { %v3473_v51 = vadd.f32 %v492_v50, %v246_v47  ;;  %v953_v47 = vld [vmem:[#allocation2 + $0x258] sm:$0xff] }
 0x1fa   :  { %v504_v53 = vmax.f32 %v3472_v49, 0.0  ;;  %v960_v49 = vld [vmem:[#allocation2 + $0x290] sm:$0xff]  ;;  %v3202_v50 = vpack.c.bf16 %v953_v47, %v950_v46  ;;  %v1434_v47 = vld [vmem:[#allocation5 + $0x1b0] sm:$0xff] }
 0x1fb   :  { %v503_v52 = vmax.f32 %v3473_v51, 0.0  ;;  %v3204_v51 = vpack.c.bf16 %v960_v49, %v957_v48  ;;  %v1441_v49 = vld [vmem:[#allocation5 + $0x1e8] sm:$0xff] }
 0x1fd   :  { %618 = vmatmul.mubr.f32.vlgmr.msra.gmra.mrb[8].mxu0 %v503_v52  ;;  %2967 = vmatprep.mubr.f32.mxu1 %v503_v52  ;;  %v956_v52 = vld [vmem:[#allocation2 + $0x270] sm:$0xff] }
 0x1fe   :  { %2968 = vmatmul.mubr.f32.vlgmr.msra.gmra.mrb[6].mxu1 %v504_v53  ;;  %623 = vmatprep.mubr.f32.mxu0 %v3631_v0 }
 0x1ff   :  { %3023 = vmatprep.mubr.msk.f32.mxu1 %vm3633_vm2, %v3631_v0  ;;  %3222 = vmatpush3.bf16.msra.mxu1 %v3221_v57 }
 0x200   :  { %3223 = vmatprep.subr.bf16.mxu1 %v3632_v54 }
 0x201   :  { %624 = vmatmul.mubr.f32.gmra.mrb[10].mxu0 %v504_v53  ;;  %v959_v53 = vld [vmem:[#allocation2 + $0x288] sm:$0xff] }
 0x202   :  { %2974 = vmatprep.mubr.msk.f32.mxu0 %vm3633_vm2, %v3631_v0  ;;  %v3206_v56 = vpack.c.bf16 %v959_v53, %v956_v52  ;;  %v1446_v53 = vld [vmem:[#allocation5 + $0x210] sm:$0xff] }
 0x203   :  { %3225 = vmatpush3.bf16.msra.mxu1 %v3224_v60  ;;  %v969_v60 = vld [vmem:[#allocation2 + $0x2d8] sm:$0xff] }
 0x204   :  { %3226 = vmatprep.subr.bf16.mxu1 %v3632_v54 }
 0x207   :  { %3228 = vmatpush3.bf16.msra.mxu1 %v3227_v63  ;;  %v3212_v63 = vpack.c.bf16 %v972_v61, %v969_v60 }
 0x208   :  { %3229 = vmatprep.subr.bf16.mxu1 %v3632_v54 }
 0x20b   :  { %3231 = vmatpush3.bf16.msra.mxu1 %v3230_v3  ;;  %v3214_v3 = vpack.c.bf16 %v971_v2, %v968_v1 }
 0x20c   :  { %3232 = vmatprep.subr.bf16.mxu1 %v3632_v54 }
 0x20f   :  { %3234 = vmatpush3.bf16.msra.mxu1 %v3233_v6  ;;  %v3216_v6 = vpack.c.bf16 %v978_v5, %v975_v4  ;;  %v1383_v4 = vld [vmem:[#allocation5 + $0x18] sm:$0xff]  ;;  %v1389_v5 = vld [vmem:[#allocation5 + $0x48] sm:$0xff] }
 0x210   :  { %3235 = vmatprep.subr.bf16.mxu1 %v3632_v54  ;;  %v3276_v8 = vpack.c.bf16 %v1389_v5, %v1383_v4  ;;  %v1390_v4 = vld [vmem:[#allocation5 + $0x50] sm:$0xff] }
 0x213   :  { %3237 = vmatpush3.bf16.msra.mxu1 %v3236_v9  ;;  %v976_v9 = vld [vmem:[#allocation2 + $0x310] sm:$0xff] }
 0x214   :  { %3238 = vmatprep.subr.bf16.mxu1 %v3632_v54 }
 0x217   :  { %3240 = vmatpush3.bf16.msra.mxu1 %v3239_v12  ;;  %v3242_v12 = vpack.c.bf16 %v979_v11, %v976_v9  ;;  %v1382_v9 = vld [vmem:[#allocation5 + $0x10] sm:$0xff]  ;;  %v1395_v11 = vld [vmem:[#allocation5 + $0x78] sm:$0xff] }
 0x218   :  { %3241 = vmatprep.subr.bf16.mxu1 %v3632_v54 }
 0x21b   :  { %3243 = vmatpush3.bf16.msra.mxu1 %v3242_v12  ;;  %v1401_v12 = vld [vmem:[#allocation5 + $0xa8] sm:$0xff] }
 0x2d0   :  { %v619_v13 = vpop.f32.mrb[8].mxu0 }
 0x2d1   :  { %v621_v14 = vpop.f32.mrb[9].mxu0  ;;  %v2969_v15 = vpop.f32.mrb[6].mxu1 }
 0x2d2   :  { %v696_v16 = vpop.f32.mrb[7].mxu1 }
 0x2d3   :  { %v3186_v17 = vpack.c.bf16 %v2969_v15, %v696_v16 }
 0x2d4   :  { %v625_v18 = vpop.f32.mrb[10].mxu0 }
 0x2d5   :  { %v3180_v19 = vpack.c.bf16 %v625_v18, %v619_v13  ;;  %v627_v20 = vpop.f32.mrb[11].mxu0  ;;  %v705_v13 = vld [vmem:[%s3936_s4 + $0x10] ss:$0 sm:$0xff]  ;;  %v1122_v18 = vld [vmem:[%s3935_s3 + $0x48] sm:$0xff] }
 0x2d6   :  { %v3183_v21 = vpack.c.bf16 %v627_v20, %v621_v14  ;;  %v1387_v20 = vld [vmem:[#allocation5 + $0x38] sm:$0xff] }
 0x2d7   :  { %3181 = vmatpush3.bf16.msra.mxu0 %v3180_v19  ;;  %v1381_v19 = vld [vmem:[#allocation5 + $0x8] sm:$0xff] }
 0x2d8   :  { %3182 = vmatprep.subr.bf16.mxu0 %v3632_v54 }
 0x2da   :  { %2975 = vmatmul.mubr.msk.f32.vlgmr.msra.gmra.mrb[12].mxu0 %vm59_vm0, %v706_v22  ;;  %v3244_v22 = vpack.c.bf16 %v1387_v20, %v1381_v19  ;;  %v1413_v19 = vld [vmem:[#allocation5 + $0x108] sm:$0xff] }
 0x2db   :  { %3184 = vmatpush3.bf16.msra.mxu0 %v3183_v21  ;;  %2981 = vmatprep.mubr.msk.f32.mxu0 %vm3633_vm2, %v3631_v0  ;;  %v1380_v21 = vld [vmem:[#allocation5] sm:$0xff] }
 0x2dc   :  { %3185 = vmatprep.subr.bf16.mxu0 %v3632_v54  ;;  %v963_v54 = vld [vmem:[#allocation2 + $0x2a8] sm:$0xff]  ;;  %v3246_v24 = vpack.c.bf16 %v1386_v23, %v1380_v21  ;;  %3245 = vmatprep.subr.bf16.mxu1 %v3244_v22  ;;  %v1406_v22 = vld [vmem:[#allocation5 + $0xd0] sm:$0xff]  ;;  %v1412_v23 = vld [vmem:[#allocation5 + $0x100] sm:$0xff] }
 0x2dd   :  { %v3208_v57 = vpack.c.bf16 %v966_v55, %v963_v54  ;;  %v1453_v55 = vld [vmem:[#allocation5 + $0x248] sm:$0xff] }
 0x2e2   :  { %2982 = vmatmul.mubr.msk.f32.vlgmr.msra.gmra.mrb[12].mxu0 %vm59_vm0, %v781_v25  ;;  %v1393_v25 = vld [vmem:[#allocation5 + $0x68] sm:$0xff] }
 0x2e3   :  { %3187 = vmatpush3.bf16.msra.mxu0 %v3186_v17  ;;  %2988 = vmatprep.mubr.msk.f32.mxu0 %vm3633_vm2, %v3631_v0 }
 0x2e4   :  { %3189 = vmatprep.subr.bf16.mxu0 %v3188_v26  ;;  %v1399_v26 = vld [vmem:[#allocation5 + $0x98] sm:$0xff] }
 0x2e5   :  { %v3248_v29 = vpack.c.bf16 %v1399_v26, %v1393_v25  ;;  %v1425_v25 = vld [vmem:[#allocation5 + $0x168] sm:$0xff]  ;;  %v3286_v26 = vpack.c.bf16 %v1412_v23, %v1406_v22  ;;  %v1427_v23 = vld [vmem:[#allocation5 + $0x178] sm:$0xff] }
 0x2e6   :  { %v1421_v22 = vld [vmem:[#allocation5 + $0x148] sm:$0xff] }
 0x2ea   :  { %2989 = vmatmul.mubr.msk.f32.vlgmr.msra.gmra.mrb[12].mxu0 %vm59_vm0, %v856_v31  ;;  %v1405_v31 = vld [vmem:[#allocation5 + $0xc8] sm:$0xff] }
 0x2eb   :  { %3191 = vmatpush1.bf16.msra.mxu0 %v3190_v32  ;;  %1044 = vmatprep.mubr.f32.mxu0 %v3631_v0  ;;  %v1411_v32 = vld [vmem:[#allocation5 + $0xf8] sm:$0xff] }
 0x2ec   :  { %3193 = vmatprep.subr.bf16.mxu0 %v3192_v33  ;;  %v3252_v33 = vpack.c.bf16 %v1411_v32, %v1405_v31  ;;  %v1437_v31 = vld [vmem:[#allocation5 + $0x1c8] sm:$0xff] }
 0x2ef   :  { %3195 = vmatpush1.bf16.msra.mxu0 %v3194_v38  ;;  %v1423_v38 = vld [vmem:[#allocation5 + $0x158] sm:$0xff] }
 0x2f0   :  { %3197 = vmatprep.subr.bf16.mxu0 %v3196_v39  ;;  %v1416_v39 = vld [vmem:[#allocation5 + $0x120] sm:$0xff]  ;;  %v3256_v40 = vpack.c.bf16 %v1423_v38, %v1417_v37  ;;  %v1449_v37 = vld [vmem:[#allocation5 + $0x228] sm:$0xff]  ;;  %v3294_v38 = vpack.c.bf16 %v1436_v35, %v1430_v34  ;;  %v1451_v35 = vld [vmem:[#allocation5 + $0x238] sm:$0xff] }
 0x2f1   :  { %v3258_v42 = vpack.c.bf16 %v1422_v41, %v1416_v39  ;;  %v1448_v41 = vld [vmem:[#allocation5 + $0x220] sm:$0xff]  ;;  %v1445_v34 = vld [vmem:[#allocation5 + $0x208] sm:$0xff] }
 0x2f3   :  { %3199 = vmatpush1.bf16.msra.mxu0 %v3198_v44  ;;  %v1435_v44 = vld [vmem:[#allocation5 + $0x1b8] sm:$0xff] }
 0x2f4   :  { %3201 = vmatprep.subr.bf16.mxu0 %v3200_v45  ;;  %v1428_v45 = vld [vmem:[#allocation5 + $0x180] sm:$0xff]  ;;  %v3260_v46 = vpack.c.bf16 %v1435_v44, %v1429_v43  ;;  %v1461_v43 = vld [vmem:[#allocation5 + $0x288] sm:$0xff] }
 0x2f5   :  { %v3262_v48 = vpack.c.bf16 %v1434_v47, %v1428_v45  ;;  %v1460_v47 = vld [vmem:[#allocation5 + $0x280] sm:$0xff] }
 0x2f7   :  { %3203 = vmatpush1.bf16.msra.mxu0 %v3202_v50  ;;  %v1447_v50 = vld [vmem:[#allocation5 + $0x218] sm:$0xff] }
 0x2f8   :  { %3205 = vmatprep.subr.bf16.mxu0 %v3204_v51  ;;  %v1440_v51 = vld [vmem:[#allocation5 + $0x1e0] sm:$0xff]  ;;  %v3264_v52 = vpack.c.bf16 %v1447_v50, %v1441_v49  ;;  %v1465_v49 = vld [vmem:[#allocation5 + $0x2a8] sm:$0xff]  ;;  %v1471_v50 = vld [vmem:[#allocation5 + $0x2d8] sm:$0xff] }
 0x2f9   :  { %v3266_v54 = vpack.c.bf16 %v1446_v53, %v1440_v51  ;;  %v3272_v51 = vpack.c.bf16 %v1471_v50, %v1465_v49  ;;  %v1470_v53 = vld [vmem:[#allocation5 + $0x2d0] sm:$0xff]  ;;  %v1468_v50 = vld [vmem:[#allocation5 + $0x2c0] sm:$0xff] }
 0x2fb   :  { %3207 = vmatpush1.bf16.msra.mxu0 %v3206_v56  ;;  %v1459_v56 = vld [vmem:[#allocation5 + $0x278] sm:$0xff] }
 0x2fc   :  { %3209 = vmatprep.subr.bf16.mxu0 %v3208_v57  ;;  %v1452_v57 = vld [vmem:[#allocation5 + $0x240] sm:$0xff]  ;;  %v3268_v58 = vpack.c.bf16 %v1459_v56, %v1453_v55  ;;  %v1473_v56 = vld [vmem:[#allocation5 + $0x2e8] sm:$0xff] }
 0x2fd   :  { %v3270_v60 = vpack.c.bf16 %v1458_v59, %v1452_v57  ;;  %v1466_v57 = vld [vmem:[#allocation5 + $0x2b0] sm:$0xff] }
 0x2ff   :  { %3211 = vmatpush1.bf16.msra.mxu0 %v3210_v62 }
 0x300   :  { %3213 = vmatprep.subr.bf16.mxu0 %v3212_v63  ;;  %v1123_v63 = vld [vmem:[%s3935_s3 + $0x50] sm:$0xff] }
 0x303   :  { %3215 = vmatpush1.bf16.msra.mxu0 %v3214_v3  ;;  %v1208_v3 = vld [vmem:[%s3935_s3 + $0x58] sm:$0xff] }
 0x304   :  { %3217 = vmatprep.subr.bf16.mxu0 %v3216_v6  ;;  %v1209_v6 = vld [vmem:[%s3935_s3 + $0x60] sm:$0xff] }
 0x307   :  { %3219 = vmatpush1.bf16.msra.mxu0 %v3218_v10  ;;  %v1388_v10 = vld [vmem:[#allocation5 + $0x40] sm:$0xff] }
 0x3bd   :  { %v926_v14 = vpop.f32.mrb[12].mxu0 }
 0x3be   :  { %v3474_v15 = vadd.f32 %v926_v14, %v705_v13  ;;  %v2990_v16 = vpop.f32.mrb[13].mxu0  ;;  %v1294_v13 = vld [vmem:[%s3935_s3 + $0x70] sm:$0xff]  ;;  %v3278_v14 = vpack.c.bf16 %v1388_v10, %v1382_v9 }
 0x3bf   :  { %v1394_v16 = vld [vmem:[#allocation5 + $0x70] sm:$0xff] }
 0x3c0   :  { %v931_v17 = vmax.f32 %v3474_v15, 0.0  ;;  %v3280_v15 = vpack.c.bf16 %v1401_v12, %v1395_v11 }
 0x3c2   :  { %1045 = vmatmul.mubr.f32.vlgmr.msra.gmra.mrb[14].mxu0 %v931_v17  ;;  %3024 = vmatmul.mubr.f32.vlgmr.msra.gmra.mrb[8].mxu1 %v931_v17  ;;  %v1400_v17 = vld [vmem:[#allocation5 + $0xa0] sm:$0xff] }
 0x3c3   :  { %1540 = vmatprep.mubr.f32.mxu1 %v3631_v0  ;;  %3028 = vmatprep.mubr.msk.f32.mxu0 %vm1124_vm3, %v1122_v18  ;;  %v1407_v18 = vld [vmem:[#allocation5 + $0xd8] sm:$0xff]  ;;  %v3282_v20 = vpack.c.bf16 %v1400_v17, %v1394_v16 }
 0x3c4   :  { %3247 = vmatpush1.bf16.msra.mxu1 %v3246_v24  ;;  %v3284_v21 = vpack.c.bf16 %v1413_v19, %v1407_v18  ;;  %v1419_v24 = vld [vmem:[#allocation5 + $0x138] sm:$0xff] }
 0x3c5   :  { %3249 = vmatprep.subr.bf16.mxu1 %v3248_v29  ;;  %v3288_v27 = vpack.c.bf16 %v1425_v25, %v1419_v24  ;;  %v1424_v29 = vld [vmem:[#allocation5 + $0x160] sm:$0xff]  ;;  %v1415_v16 = vld [vmem:[#allocation5 + $0x118] sm:$0xff]  ;;  %v3320_v25 = vpack.c.bf16 %v1427_v23, %v1421_v22  ;;  %v2097_v23 = vld [vmem:[#allocation2 + $0x420] sm:$0xff] }
 0x3c6   :  { %v3290_v32 = vpack.c.bf16 %v1424_v29, %v1418_v28  ;;  %v1433_v28 = vld [vmem:[#allocation5 + $0x1a8] sm:$0xff]  ;;  %v1439_v29 = vld [vmem:[#allocation5 + $0x1d8] sm:$0xff] }
 0x3c8   :  { %3251 = vmatpush1.bf16.msra.mxu1 %v3250_v30  ;;  %v1431_v30 = vld [vmem:[#allocation5 + $0x198] sm:$0xff] }
 0x3c9   :  { %3253 = vmatprep.subr.bf16.mxu1 %v3252_v33  ;;  %v3292_v33 = vpack.c.bf16 %v1437_v31, %v1431_v30  ;;  %v3324_v31 = vpack.c.bf16 %v1439_v29, %v1433_v28  ;;  %v2103_v29 = vld [vmem:[#allocation2 + $0x450] sm:$0xff] }
 0x3cc   :  { %3255 = vmatpush1.bf16.msra.mxu1 %v3254_v36  ;;  %v1443_v36 = vld [vmem:[#allocation5 + $0x1f8] sm:$0xff] }
 0x3cd   :  { %3257 = vmatprep.subr.bf16.mxu1 %v3256_v40  ;;  %v3296_v39 = vpack.c.bf16 %v1449_v37, %v1443_v36  ;;  %v1442_v40 = vld [vmem:[#allocation5 + $0x1f0] sm:$0xff]  ;;  %v3328_v37 = vpack.c.bf16 %v1451_v35, %v1445_v34 }
 0x3ce   :  { %v3298_v44 = vpack.c.bf16 %v1448_v41, %v1442_v40  ;;  %v1457_v40 = vld [vmem:[#allocation5 + $0x268] sm:$0xff]  ;;  %v1463_v41 = vld [vmem:[#allocation5 + $0x298] sm:$0xff]  ;;  %v2109_v35 = vld [vmem:[#allocation2 + $0x480] sm:$0xff] }
 0x3d0   :  { %3259 = vmatpush1.bf16.msra.mxu1 %v3258_v42  ;;  %v1455_v42 = vld [vmem:[#allocation5 + $0x258] sm:$0xff] }
 0x3d1   :  { %3261 = vmatprep.subr.bf16.mxu1 %v3260_v46  ;;  %v3300_v45 = vpack.c.bf16 %v1461_v43, %v1455_v42  ;;  %v1454_v46 = vld [vmem:[#allocation5 + $0x250] sm:$0xff]  ;;  %v3332_v43 = vpack.c.bf16 %v1463_v41, %v1457_v40  ;;  %v2115_v41 = vld [vmem:[#allocation2 + $0x4b0] sm:$0xff] }
 0x3d4   :  { %3263 = vmatpush1.bf16.msra.mxu1 %v3262_v48  ;;  %v3302_v48 = vpack.c.bf16 %v1460_v47, %v1454_v46  ;;  %v1469_v46 = vld [vmem:[#allocation5 + $0x2c8] sm:$0xff]  ;;  %v1475_v47 = vld [vmem:[#allocation5 + $0x2f8] sm:$0xff] }
 0x3d5   :  { %3265 = vmatprep.subr.bf16.mxu1 %v3264_v52  ;;  %v1464_v52 = vld [vmem:[#allocation5 + $0x2a0] sm:$0xff]  ;;  %v3336_v49 = vpack.c.bf16 %v1475_v47, %v1469_v46  ;;  %v2121_v47 = vld [vmem:[#allocation2 + $0x4e0] sm:$0xff] }
 0x3d6   :  { %v3274_v55 = vpack.c.bf16 %v1470_v53, %v1464_v52  ;;  %v2068_v53 = vld [vmem:[#allocation2 + $0x338] sm:$0xff] }
 0x3d8   :  { %3267 = vmatpush1.bf16.msra.mxu1 %v3266_v54  ;;  %v1467_v54 = vld [vmem:[#allocation5 + $0x2b8] sm:$0xff] }
 0x3d9   :  { %3269 = vmatprep.subr.bf16.mxu1 %v3268_v58  ;;  %v1472_v58 = vld [vmem:[#allocation5 + $0x2e0] sm:$0xff]  ;;  %v3304_v59 = vpack.c.bf16 %v1473_v56, %v1467_v54 }
 0x3da   :  { %v2071_v54 = vld [vmem:[#allocation2 + $0x350] sm:$0xff] }
 0x3db   :  { %v3352_v56 = vpack.c.bf16 %v2071_v54, %v2068_v53  ;;  %v2127_v53 = vld [vmem:[#allocation2 + $0x510] sm:$0xff]  ;;  %v2130_v54 = vld [vmem:[#allocation2 + $0x528] sm:$0xff] }
 0x3dc   :  { %3271 = vmatpush1.bf16.msra.mxu1 %v3270_v60  ;;  %v3306_v60 = vpack.c.bf16 %v1472_v58, %v1466_v57  ;;  %v2070_v57 = vld [vmem:[#allocation2 + $0x348] sm:$0xff] }
 0x3dd   :  { %3273 = vmatprep.subr.bf16.mxu1 %v3272_v51  ;;  %v1474_v51 = vld [vmem:[#allocation5 + $0x2f0] sm:$0xff]  ;;  %v2074_v58 = vld [vmem:[#allocation2 + $0x368] sm:$0xff] }
 0x3de   :  { %v3338_v52 = vpack.c.bf16 %v1474_v51, %v1468_v50  ;;  %v2131_v50 = vld [vmem:[#allocation2 + $0x530] sm:$0xff] }
 0x3e0   :  { %3275 = vmatpush1.bf16.msra.mxu1 %v3274_v55  ;;  %v2067_v55 = vld [vmem:[#allocation2 + $0x330] sm:$0xff] }
 0x495   :  { %v1046_v61 = vpop.f32.mrb[14].mxu0  ;;  %v1117_v62 = vpop.f32.mrb[8].mxu1 }
 0x496   :  { %v1048_v1 = vpop.f32.mrb[15].mxu0  ;;  %v3025_v2 = vpop.f32.mrb[9].mxu1  ;;  %3026 = vmatprep.subr.mxu0 %v1046_v61 }
 0x497   :  { %3027 = vmatpush3.msra.mxu0 %v1046_v61  ;;  %v1385_v61 = vld [vmem:[#allocation5 + $0x28] sm:$0xff] }
 0x498   :  { %3029 = vmatmul.mubr.msk.f32.vlgmr.msra.gmra.mrb[16].mxu0 %vm1124_vm3, %v1123_v63  ;;  %3031 = vmatprep.subr.mxu0 %v1048_v1 }
 0x499   :  { %3032 = vmatpush3.msra.mxu0 %v1048_v1  ;;  %3033 = vmatprep.mubr.msk.f32.mxu0 %vm1124_vm3, %v1208_v3  ;;  %v1121_v1 = vld [vmem:[%s3936_s4 + $0x20] ss:$0 sm:$0xff]  ;;  %v1384_v3 = vld [vmem:[#allocation5 + $0x20] sm:$0xff] }
 0x49a   :  { %3036 = vmatprep.subr.mxu0 %v1117_v62  ;;  %v3310_v9 = vpack.c.bf16 %v1390_v4, %v1384_v3 }
 0x4a0   :  { %3034 = vmatmul.mubr.msk.f32.vlgmr.msra.gmra.mrb[16].mxu0 %vm1124_vm3, %v1209_v6  ;;  %v1397_v6 = vld [vmem:[#allocation5 + $0x88] sm:$0xff] }
 0x4a1   :  { %3037 = vmatpush3.msra.mxu0 %v1117_v62  ;;  %3038 = vmatprep.mubr.msk.f32.mxu0 %vm1124_vm3, %v1293_v7  ;;  %v1391_v62 = vld [vmem:[#allocation5 + $0x58] sm:$0xff] }
 0x4a2   :  { %3277 = vmatprep.subr.bf16.mxu0 %v3276_v8  ;;  %v3308_v63 = vpack.c.bf16 %v1391_v62, %v1385_v61  ;;  %v1403_v7 = vld [vmem:[#allocation5 + $0xb8] sm:$0xff]  ;;  %v2073_v62 = vld [vmem:[#allocation2 + $0x360] sm:$0xff] }
 0x4a3   :  { %v3312_v12 = vpack.c.bf16 %v1403_v7, %v1397_v6  ;;  %v2082_v6 = vld [vmem:[#allocation2 + $0x3a8] sm:$0xff] }
 0x4a4   :  { %3309 = vmatprep.subr.bf16.mxu1 %v3308_v63  ;;  %v2076_v63 = vld [vmem:[#allocation2 + $0x378] sm:$0xff]  ;;  %v2086_v7 = vld [vmem:[#allocation2 + $0x3c8] sm:$0xff] }
 0x4a5   :  { %v3358_v3 = vpack.c.bf16 %v2076_v63, %v2073_v62  ;;  %v2143_v62 = vld [vmem:[#allocation2 + $0x590] sm:$0xff] }
 0x4a8   :  { %3039 = vmatmul.mubr.msk.f32.vlgmr.msra.gmra.mrb[16].mxu0 %vm1124_vm3, %v1294_v13  ;;  %v1396_v13 = vld [vmem:[#allocation5 + $0x80] sm:$0xff] }
 0x4a9   :  { %3279 = vmatpush1.bf16.msra.mxu0 %v3278_v14  ;;  %1617 = vmatprep.mubr.f32.mxu0 %v3631_v0  ;;  %v1402_v14 = vld [vmem:[#allocation5 + $0xb0] sm:$0xff] }
 0x4aa   :  { %3281 = vmatprep.subr.bf16.mxu0 %v3280_v15  ;;  %v1409_v15 = vld [vmem:[#allocation5 + $0xe8] sm:$0xff]  ;;  %v3314_v17 = vpack.c.bf16 %v1402_v14, %v1396_v13  ;;  %v2095_v14 = vld [vmem:[#allocation2 + $0x410] sm:$0xff] }
 0x4ab   :  { %v3316_v19 = vpack.c.bf16 %v1415_v16, %v1409_v15  ;;  %v2092_v13 = vld [vmem:[#allocation2 + $0x3f8] sm:$0xff] }
 0x4ac   :  { %v3368_v16 = vpack.c.bf16 %v2095_v14, %v2092_v13 }
 0x4ad   :  { %3283 = vmatpush1.bf16.msra.mxu0 %v3282_v20  ;;  %v1408_v20 = vld [vmem:[#allocation5 + $0xe0] sm:$0xff] }
 0x4ae   :  { %3285 = vmatprep.subr.bf16.mxu0 %v3284_v21  ;;  %v1414_v21 = vld [vmem:[#allocation5 + $0x110] sm:$0xff] }
 0x4af   :  { %v3318_v24 = vpack.c.bf16 %v1414_v21, %v1408_v20  ;;  %v2101_v20 = vld [vmem:[#allocation2 + $0x440] sm:$0xff] }
 0x4b1   :  { %3287 = vmatpush1.bf16.msra.mxu0 %v3286_v26  ;;  %v1420_v26 = vld [vmem:[#allocation5 + $0x140] sm:$0xff] }
 0x4b2   :  { %3289 = vmatprep.subr.bf16.mxu0 %v3288_v27  ;;  %v1426_v27 = vld [vmem:[#allocation5 + $0x170] sm:$0xff] }
 0x4b3   :  { %v3322_v30 = vpack.c.bf16 %v1426_v27, %v1420_v26  ;;  %v2107_v26 = vld [vmem:[#allocation2 + $0x470] sm:$0xff] }
 0x4b5   :  { %3291 = vmatpush1.bf16.msra.mxu0 %v3290_v32  ;;  %v1432_v32 = vld [vmem:[#allocation5 + $0x1a0] sm:$0xff] }
 0x4b6   :  { %3293 = vmatprep.subr.bf16.mxu0 %v3292_v33  ;;  %v1438_v33 = vld [vmem:[#allocation5 + $0x1d0] sm:$0xff] }
 0x4b7   :  { %v3326_v36 = vpack.c.bf16 %v1438_v33, %v1432_v32  ;;  %v2113_v32 = vld [vmem:[#allocation2 + $0x4a0] sm:$0xff] }
 0x4b9   :  { %3295 = vmatpush1.bf16.msra.mxu0 %v3294_v38  ;;  %v1444_v38 = vld [vmem:[#allocation5 + $0x200] sm:$0xff] }
 0x4ba   :  { %3297 = vmatprep.subr.bf16.mxu0 %v3296_v39  ;;  %v1450_v39 = vld [vmem:[#allocation5 + $0x230] sm:$0xff] }
 0x4bb   :  { %v3330_v42 = vpack.c.bf16 %v1450_v39, %v1444_v38  ;;  %v2119_v38 = vld [vmem:[#allocation2 + $0x4d0] sm:$0xff] }
 0x4bd   :  { %3299 = vmatpush1.bf16.msra.mxu0 %v3298_v44  ;;  %v1456_v44 = vld [vmem:[#allocation5 + $0x260] sm:$0xff] }
 0x4be   :  { %3301 = vmatprep.subr.bf16.mxu0 %v3300_v45  ;;  %v1462_v45 = vld [vmem:[#allocation5 + $0x290] sm:$0xff] }
 0x4c1   :  { %3303 = vmatpush1.bf16.msra.mxu0 %v3302_v48  ;;  %v3334_v48 = vpack.c.bf16 %v1462_v45, %v1456_v44  ;;  %v2125_v44 = vld [vmem:[#allocation2 + $0x500] sm:$0xff] }
 0x4c2   :  { %3305 = vmatprep.subr.bf16.mxu0 %v3304_v59  ;;  %v2077_v59 = vld [vmem:[#allocation2 + $0x380] sm:$0xff] }
 0x4c3   :  { %v3356_v61 = vpack.c.bf16 %v2077_v59, %v2074_v58  ;;  %v2133_v59 = vld [vmem:[#allocation2 + $0x540] sm:$0xff] }
 0x4c5   :  { %3307 = vmatpush1.bf16.msra.mxu0 %v3306_v60  ;;  %v3354_v60 = vpack.c.bf16 %v2070_v57, %v2067_v55  ;;  %v2134_v55 = vld [vmem:[#allocation2 + $0x548] sm:$0xff]  ;;  %v3394_v57 = vpack.c.bf16 %v2130_v54, %v2127_v53  ;;  %v2132_v53 = vld [vmem:[#allocation2 + $0x538] sm:$0xff]  ;;  %v1947_v54 = vld [vmem:[%s3935_s3 + $0xc0] sm:$0xff] }
 0x57b   :  { %v3040_v2 = vpop.f32.mrb[16].mxu0 }
 0x57c   :  { %v1367_v5 = vpop.f32.mrb[17].mxu0  ;;  %v3475_v10 = vadd.f32 %v3040_v2, %v1121_v1  ;;  %v2083_v2 = vld [vmem:[#allocation2 + $0x3b0] sm:$0xff] }
 0x57d   :  { %v3476_v8 = vadd.f32 %v1367_v5, %v1121_v1  ;;  %v2080_v1 = vld [vmem:[#allocation2 + $0x398] sm:$0xff]  ;;  %v2079_v5 = vld [vmem:[#allocation2 + $0x390] sm:$0xff] }
 0x57e   :  { %v1379_v18 = vmax.f32 %v3475_v10, 0.0  ;;  %v3360_v4 = vpack.c.bf16 %v2083_v2, %v2080_v1  ;;  %v2139_v2 = vld [vmem:[#allocation2 + $0x570] sm:$0xff] }
 0x57f   :  { %v3797_v11 = vmax.f32 %v3476_v8, 0.0  ;;  %v2089_v8 = vld [vmem:[#allocation2 + $0x3e0] sm:$0xff] }
 0x580   :  { %v3364_v10 = vpack.c.bf16 %v2089_v8, %v2086_v7  ;;  %v2145_v8 = vld [vmem:[#allocation2 + $0x5a0] sm:$0xff] }
 0x581   :  { %1541 = vmatmul.mubr.f32.vlgmr.msra.gmra.mrb[10].mxu1 %v3797_v11  ;;  %1618 = vmatmul.mubr.f32.vlgmr.msra.gmra.mrb[18].mxu0 %v3797_v11 }
 0x582   :  { %3311 = vmatpush1.bf16.msra.mxu1 %v3310_v9  ;;  %1546 = vmatprep.mubr.f32.mxu1 %v3631_v0  ;;  %v3362_v9 = vpack.c.bf16 %v2082_v6, %v2079_v5  ;;  %v2149_v5 = vld [vmem:[#allocation2 + $0x5c0] sm:$0xff] }
 0x583   :  { %1623 = vmatprep.mubr.f32.mxu0 %v3631_v0  ;;  %3313 = vmatprep.subr.bf16.mxu1 %v3312_v12  ;;  %v2088_v12 = vld [vmem:[#allocation2 + $0x3d8] sm:$0xff] }
 0x585   :  { %1547 = vmatmul.mubr.f32.gmra.mrb[12].mxu1 %v1379_v18  ;;  %1624 = vmatmul.mubr.f32.gmra.mrb[20].mxu0 %v1379_v18 }
 0x586   :  { %3315 = vmatpush1.bf16.msra.mxu1 %v3314_v17  ;;  %1694 = vmatprep.mubr.f32.mxu1 %v3631_v0  ;;  %v2091_v17 = vld [vmem:[#allocation2 + $0x3f0] sm:$0xff] }
 0x587   :  { %3317 = vmatprep.subr.bf16.mxu1 %v3316_v19  ;;  %1789 = vmatprep.mubr.f32.mxu0 %v3631_v0  ;;  %v2098_v19 = vld [vmem:[#allocation2 + $0x428] sm:$0xff] }
 0x588   :  { %v3372_v22 = vpack.c.bf16 %v2101_v20, %v2098_v19 }
 0x58a   :  { %3319 = vmatpush1.bf16.msra.mxu1 %v3318_v24  ;;  %v2100_v24 = vld [vmem:[#allocation2 + $0x438] sm:$0xff] }
 0x58b   :  { %3321 = vmatprep.subr.bf16.mxu1 %v3320_v25  ;;  %v2104_v25 = vld [vmem:[#allocation2 + $0x458] sm:$0xff]  ;;  %v3374_v27 = vpack.c.bf16 %v2100_v24, %v2097_v23 }
 0x58c   :  { %v3376_v28 = vpack.c.bf16 %v2107_v26, %v2104_v25  ;;  %v1709_v26 = vld [vmem:[%s3935_s3 + $0x78] sm:$0xff] }
 0x58e   :  { %3323 = vmatpush1.bf16.msra.mxu1 %v3322_v30  ;;  %v2106_v30 = vld [vmem:[#allocation2 + $0x468] sm:$0xff] }
 0x58f   :  { %3325 = vmatprep.subr.bf16.mxu1 %v3324_v31  ;;  %v2110_v31 = vld [vmem:[#allocation2 + $0x488] sm:$0xff]  ;;  %v3378_v33 = vpack.c.bf16 %v2106_v30, %v2103_v29  ;;  %v1712_v29 = vld [vmem:[%s3935_s3 + $0x90] sm:$0xff]  ;;  %v1833_v30 = vld [vmem:[%s3935_s3 + $0x98] sm:$0xff] }
 0x590   :  { %v3380_v34 = vpack.c.bf16 %v2113_v32, %v2110_v31  ;;  %v1834_v31 = vld [vmem:[%s3935_s3 + $0xa0] sm:$0xff] }
 0x592   :  { %3327 = vmatpush1.bf16.msra.mxu1 %v3326_v36  ;;  %v2112_v36 = vld [vmem:[#allocation2 + $0x498] sm:$0xff] }
 0x593   :  { %3329 = vmatprep.subr.bf16.mxu1 %v3328_v37  ;;  %v2116_v37 = vld [vmem:[#allocation2 + $0x4b8] sm:$0xff]  ;;  %v3382_v39 = vpack.c.bf16 %v2112_v36, %v2109_v35  ;;  %v2117_v35 = vld [vmem:[#allocation2 + $0x4c0] sm:$0xff] }
 0x594   :  { %v3384_v40 = vpack.c.bf16 %v2119_v38, %v2116_v37  ;;  %v2120_v36 = vld [vmem:[#allocation2 + $0x4d8] sm:$0xff] }
 0x596   :  { %3331 = vmatpush1.bf16.msra.mxu1 %v3330_v42  ;;  %v2118_v42 = vld [vmem:[#allocation2 + $0x4c8] sm:$0xff] }
 0x597   :  { %3333 = vmatprep.subr.bf16.mxu1 %v3332_v43  ;;  %v2122_v43 = vld [vmem:[#allocation2 + $0x4e8] sm:$0xff]  ;;  %v3386_v45 = vpack.c.bf16 %v2118_v42, %v2115_v41  ;;  %v3416_v42 = vpack.c.bf16 %v2120_v36, %v2117_v35 }
 0x598   :  { %v3388_v46 = vpack.c.bf16 %v2125_v44, %v2122_v43  ;;  %v2069_v43 = vld [vmem:[#allocation2 + $0x340] sm:$0xff]  ;;  %v2072_v44 = vld [vmem:[#allocation2 + $0x358] sm:$0xff]  ;;  %v2114_v35 = vld [vmem:[#allocation2 + $0x4a8] sm:$0xff] }
 0x59a   :  { %3335 = vmatpush1.bf16.msra.mxu1 %v3334_v48  ;;  %v2124_v48 = vld [vmem:[#allocation2 + $0x4f8] sm:$0xff] }
 0x59b   :  { %3337 = vmatprep.subr.bf16.mxu1 %v3336_v49  ;;  %v2128_v49 = vld [vmem:[#allocation2 + $0x518] sm:$0xff]  ;;  %v3390_v51 = vpack.c.bf16 %v2124_v48, %v2121_v47  ;;  %v3418_v48 = vpack.c.bf16 %v2072_v44, %v2069_v43 }
 0x59c   :  { %v1946_v47 = vld [vmem:[%s3935_s3 + $0xb8] sm:$0xff] }
 0x59e   :  { %3339 = vmatpush1.bf16.msra.mxu1 %v3338_v52  ;;  %v3392_v52 = vpack.c.bf16 %v2131_v50, %v2128_v49  ;;  %v2075_v50 = vld [vmem:[#allocation2 + $0x370] sm:$0xff] }
 0x59f   :  { %3353 = vmatprep.subr.bf16.mxu1 %v3352_v56  ;;  %v2137_v56 = vld [vmem:[#allocation2 + $0x560] sm:$0xff] }
 0x5a0   :  { %v3396_v58 = vpack.c.bf16 %v2137_v56, %v2134_v55 }
 0x5a1   :  { %1695 = vmatmul.mubr.f32.vlgmr.msra.gmra.mrb[14].mxu1 %v3797_v11  ;;  %v2085_v11 = vld [vmem:[#allocation2 + $0x3c0] sm:$0xff] }
 0x5a2   :  { %1700 = vmatprep.mubr.f32.mxu1 %v3631_v0  ;;  %3355 = vmatpush1.bf16.msra.mxu1 %v3354_v60  ;;  %v3366_v15 = vpack.c.bf16 %v2088_v12, %v2085_v11  ;;  %v2136_v60 = vld [vmem:[#allocation2 + $0x558] sm:$0xff]  ;;  %v2155_v11 = vld [vmem:[#allocation2 + $0x5f0] sm:$0xff] }
 0x5a3   :  { %3357 = vmatprep.subr.bf16.mxu1 %v3356_v61  ;;  %v2140_v61 = vld [vmem:[#allocation2 + $0x578] sm:$0xff]  ;;  %v3398_v63 = vpack.c.bf16 %v2136_v60, %v2133_v59  ;;  %v2135_v59 = vld [vmem:[#allocation2 + $0x550] sm:$0xff]  ;;  %v2138_v60 = vld [vmem:[#allocation2 + $0x568] sm:$0xff] }
 0x5a4   :  { %v3400_v1 = vpack.c.bf16 %v2143_v62, %v2140_v61  ;;  %v1948_v61 = vld [vmem:[%s3935_s3 + $0xc8] sm:$0xff] }
 0x5a5   :  { %1701 = vmatmul.mubr.f32.gmra.mrb[16].mxu1 %v1379_v18  ;;  %v2094_v18 = vld [vmem:[#allocation2 + $0x408] sm:$0xff] }
 0x5a6   :  { %3359 = vmatpush1.bf16.msra.mxu1 %v3358_v3  ;;  %v3370_v21 = vpack.c.bf16 %v2094_v18, %v2091_v17  ;;  %v2142_v3 = vld [vmem:[#allocation2 + $0x588] sm:$0xff] }
 0x5a7   :  { %3361 = vmatprep.subr.bf16.mxu1 %v3360_v4  ;;  %v2146_v4 = vld [vmem:[#allocation2 + $0x5a8] sm:$0xff]  ;;  %v3402_v6 = vpack.c.bf16 %v2142_v3, %v2139_v2  ;;  %v2141_v3 = vld [vmem:[#allocation2 + $0x580] sm:$0xff] }
 0x5a8   :  { %v3404_v7 = vpack.c.bf16 %v2149_v5, %v2146_v4  ;;  %v2090_v2 = vld [vmem:[#allocation2 + $0x3e8] sm:$0xff]  ;;  %v2144_v4 = vld [vmem:[#allocation2 + $0x598] sm:$0xff]  ;;  %v1949_v5 = vld [vmem:[%s3935_s3 + $0xd0] sm:$0xff] }
 0x5aa   :  { %3363 = vmatpush1.bf16.msra.mxu1 %v3362_v9  ;;  %v2148_v9 = vld [vmem:[#allocation2 + $0x5b8] sm:$0xff] }
 0x5ab   :  { %3365 = vmatprep.subr.bf16.mxu1 %v3364_v10  ;;  %v2152_v10 = vld [vmem:[#allocation2 + $0x5d8] sm:$0xff]  ;;  %v3406_v12 = vpack.c.bf16 %v2148_v9, %v2145_v8  ;;  %v2093_v8 = vld [vmem:[#allocation2 + $0x400] sm:$0xff] }
 0x5ac   :  { %v3408_v13 = vpack.c.bf16 %v2155_v11, %v2152_v10  ;;  %v2096_v9 = vld [vmem:[#allocation2 + $0x418] sm:$0xff]  ;;  %v2147_v10 = vld [vmem:[#allocation2 + $0x5b0] sm:$0xff]  ;;  %v2150_v11 = vld [vmem:[#allocation2 + $0x5c8] sm:$0xff] }
 0x5ae   :  { %3367 = vmatpush1.bf16.msra.mxu1 %v3366_v15 }
 0x5af   :  { %3369 = vmatprep.subr.bf16.mxu1 %v3368_v16 }
 0x5b2   :  { %3371 = vmatpush1.bf16.msra.mxu1 %v3370_v21 }
 0x5b3   :  { %3373 = vmatprep.subr.bf16.mxu1 %v3372_v22 }
 0x5b6   :  { %3375 = vmatpush1.bf16.msra.mxu1 %v3374_v27  ;;  %v1710_v27 = vld [vmem:[%s3935_s3 + $0x80] sm:$0xff] }
 0x5b7   :  { %3377 = vmatprep.subr.bf16.mxu1 %v3376_v28  ;;  %v1711_v28 = vld [vmem:[%s3935_s3 + $0x88] sm:$0xff] }
 0x5ba   :  { %3379 = vmatpush1.bf16.msra.mxu1 %v3378_v33 }
 0x5bb   :  { %3381 = vmatprep.subr.bf16.mxu1 %v3380_v34  ;;  %v1835_v34 = vld [vmem:[%s3935_s3 + $0xa8] sm:$0xff] }
 0x5be   :  { %3383 = vmatpush1.bf16.msra.mxu1 %v3382_v39 }
 0x5bf   :  { %3385 = vmatprep.subr.bf16.mxu1 %v3384_v40  ;;  %v1836_v40 = vld [vmem:[%s3935_s3 + $0xb0] sm:$0xff] }
 0x5c2   :  { %3387 = vmatpush1.bf16.msra.mxu1 %v3386_v45  ;;  %v2123_v45 = vld [vmem:[#allocation2 + $0x4f0] sm:$0xff] }
 0x5c3   :  { %3389 = vmatprep.subr.bf16.mxu1 %v3388_v46  ;;  %v2126_v46 = vld [vmem:[#allocation2 + $0x508] sm:$0xff] }
 0x5c4   :  { %v3420_v49 = vpack.c.bf16 %v2126_v46, %v2123_v45 }
 0x5c6   :  { %3391 = vmatpush1.bf16.msra.mxu1 %v3390_v51  ;;  %v2078_v51 = vld [vmem:[#allocation2 + $0x388] sm:$0xff] }
 0x5c7   :  { %3393 = vmatprep.subr.bf16.mxu1 %v3392_v52  ;;  %v2129_v52 = vld [vmem:[#allocation2 + $0x520] sm:$0xff]  ;;  %v3422_v55 = vpack.c.bf16 %v2078_v51, %v2075_v50 }
 0x5c8   :  { %v3424_v56 = vpack.c.bf16 %v2132_v53, %v2129_v52 }
 0x5ca   :  { %3395 = vmatpush1.bf16.msra.mxu1 %v3394_v57  ;;  %v2081_v57 = vld [vmem:[#allocation2 + $0x3a0] sm:$0xff] }
 0x5cb   :  { %3397 = vmatprep.subr.bf16.mxu1 %v3396_v58  ;;  %v2084_v58 = vld [vmem:[#allocation2 + $0x3b8] sm:$0xff] }
 0x5cc   :  { %v3426_v62 = vpack.c.bf16 %v2084_v58, %v2081_v57 }
 0x5ce   :  { %3399 = vmatpush1.bf16.msra.mxu1 %v3398_v63  ;;  %v3428_v63 = vpack.c.bf16 %v2138_v60, %v2135_v59 }
 0x5cf   :  { %3401 = vmatprep.subr.bf16.mxu1 %v3400_v1  ;;  %v2087_v1 = vld [vmem:[#allocation2 + $0x3d0] sm:$0xff] }
 0x5d2   :  { %3403 = vmatpush1.bf16.msra.mxu1 %v3402_v6  ;;  %v3430_v6 = vpack.c.bf16 %v2090_v2, %v2087_v1 }
 0x5d3   :  { %3405 = vmatprep.subr.bf16.mxu1 %v3404_v7  ;;  %v3432_v7 = vpack.c.bf16 %v2144_v4, %v2141_v3 }
 0x5d6   :  { %3407 = vmatpush1.bf16.msra.mxu1 %v3406_v12  ;;  %v3434_v12 = vpack.c.bf16 %v2096_v9, %v2093_v8 }
 0x5d7   :  { %3409 = vmatprep.subr.bf16.mxu1 %v3408_v13  ;;  %v3436_v13 = vpack.c.bf16 %v2150_v11, %v2147_v10 }
 0x654   :  { %v1542_v14 = vpop.f32.mrb[10].mxu1  ;;  %v1619_v15 = vpop.f32.mrb[18].mxu0 }
 0x655   :  { %v1544_v16 = vpop.f32.mrb[11].mxu1  ;;  %v1621_v17 = vpop.f32.mrb[19].mxu0 }
 0x658   :  { %v1548_v18 = vpop.f32.mrb[12].mxu1  ;;  %v1625_v19 = vpop.f32.mrb[20].mxu0 }
 0x659   :  { %v3342_v20 = vpack.c.bf16 %v1548_v18, %v1542_v14  ;;  %v3346_v21 = vpack.c.bf16 %v1625_v19, %v1619_v15  ;;  %v1550_v22 = vpop.f32.mrb[13].mxu1  ;;  %v1627_v23 = vpop.f32.mrb[21].mxu0  ;;  %v2099_v14 = vld [vmem:[#allocation2 + $0x430] sm:$0xff]  ;;  %v2153_v15 = vld [vmem:[#allocation2 + $0x5e0] sm:$0xff] }
 0x65a   :  { %v3340_v24 = vpack.c.bf16 %v1550_v22, %v1544_v16  ;;  %v3344_v25 = vpack.c.bf16 %v1627_v23, %v1621_v17  ;;  %v2156_v16 = vld [vmem:[#allocation2 + $0x5f8] sm:$0xff]  ;;  %v2151_v19 = vld [vmem:[#allocation2 + $0x5d0] sm:$0xff] }
 0x65b   :  { %v3440_v18 = vpack.c.bf16 %v2156_v16, %v2153_v15  ;;  %v2108_v23 = vld [vmem:[#allocation2 + $0x478] sm:$0xff] }
 0x65c   :  { %3341 = vmatprep.subr.bf16.mxu0 %v3340_v24 }
 0x65d   :  { %3343 = vmatpush1.bf16.msra.mxu0 %v3342_v20  ;;  %v2154_v20 = vld [vmem:[#allocation2 + $0x5e8] sm:$0xff] }
 0x65e   :  { %3345 = vmatprep.subr.bf16.mxu0 %v3344_v25  ;;  %v3410_v22 = vpack.c.bf16 %v2154_v20, %v2151_v19  ;;  %v2158_v25 = vld [vmem:[#allocation2 + $0x608] sm:$0xff] }
 0x660   :  { %2723 = vmatmul.mubr.msk.f32.vlgmr.msra.gmra.mrb[22].mxu0 %vm59_vm0, %v1709_v26  ;;  %3411 = vmatpush1.bf16.msra.mxu1 %v3410_v22  ;;  %v2161_v26 = vld [vmem:[#allocation2 + $0x620] sm:$0xff] }
 0x661   :  { %3347 = vmatpush1.bf16.msra.mxu0 %v3346_v21  ;;  %1795 = vmatprep.mubr.f32.mxu0 %v3631_v0  ;;  %v2105_v21 = vld [vmem:[#allocation2 + $0x460] sm:$0xff] }
 0x662   :  { %v3442_v24 = vpack.c.bf16 %v2108_v23, %v2105_v21 }
 0x664   :  { %2724 = vmatmul.mubr.msk.f32.gmra.mrb[24].mxu0 %vm59_vm0, %v1710_v27  ;;  %v2159_v27 = vld [vmem:[#allocation2 + $0x610] sm:$0xff] }
 0x665   :  { %1801 = vmatprep.mubr.f32.mxu0 %v3631_v0 }
 0x668   :  { %2725 = vmatmul.mubr.msk.f32.gmra.mrb[26].mxu0 %vm59_vm0, %v1711_v28  ;;  %v3412_v28 = vpack.c.bf16 %v2161_v26, %v2158_v25 }
 0x669   :  { %1807 = vmatprep.mubr.f32.mxu0 %v3631_v0 }
 0x66a   :  { %3413 = vmatprep.subr.bf16.mxu1 %v3412_v28 }
 0x66c   :  { %2726 = vmatmul.mubr.msk.f32.gmra.mrb[28].mxu0 %vm59_vm0, %v1712_v29  ;;  %v2162_v29 = vld [vmem:[#allocation2 + $0x628] sm:$0xff] }
 0x66d   :  { %1913 = vmatprep.mubr.f32.mxu0 %v3631_v0 }
 0x670   :  { %2727 = vmatmul.mubr.msk.f32.vlgmr.msra.gmra.mrb[22].mxu0 %vm59_vm0, %v1833_v30  ;;  %v2157_v30 = vld [vmem:[#allocation2 + $0x600] sm:$0xff] }
 0x671   :  { %1919 = vmatprep.mubr.f32.mxu0 %v3631_v0 }
 0x674   :  { %v1696_v32 = vpop.f32.mrb[14].mxu1  ;;  %2728 = vmatmul.mubr.msk.f32.gmra.mrb[24].mxu0 %vm59_vm0, %v1834_v31  ;;  %v2160_v31 = vld [vmem:[#allocation2 + $0x618] sm:$0xff] }
 0x675   :  { %v1698_v33 = vpop.f32.mrb[15].mxu1  ;;  %1925 = vmatprep.mubr.f32.mxu0 %v3631_v0 }
 0x678   :  { %v1702_v37 = vpop.f32.mrb[16].mxu1  ;;  %2729 = vmatmul.mubr.msk.f32.gmra.mrb[26].mxu0 %vm59_vm0, %v1835_v34  ;;  %v2111_v34 = vld [vmem:[#allocation2 + $0x490] sm:$0xff] }
 0x679   :  { %v3350_v38 = vpack.c.bf16 %v1702_v37, %v1696_v32  ;;  %v1704_v39 = vpop.f32.mrb[17].mxu1  ;;  %1931 = vmatprep.mubr.f32.mxu0 %v3631_v0  ;;  %v3444_v32 = vpack.c.bf16 %v2162_v29, %v2159_v27  ;;  %v3446_v36 = vpack.c.bf16 %v2114_v35, %v2111_v34  ;;  %v1815_v37 = vlaneseq  ;;  %v2443_v34 = vld [vmem:[%s3935_s3 + $0xf8] sm:$0xff]  ;;  %v2444_v35 = vld [vmem:[%s3935_s3 + $0x100] sm:$0xff] }
 0x67a   :  { %v3348_v41 = vpack.c.bf16 %v1704_v39, %v1698_v33  ;;  %v3414_v33 = vpack.c.bf16 %v2160_v31, %v2157_v30  ;;  %v2339_v31 = vld [vmem:[%s3935_s3 + $0xe0] sm:$0xff] }
 0x67c   :  { %3349 = vmatprep.subr.bf16.mxu0 %v3348_v41  ;;  %2730 = vmatmul.mubr.msk.f32.gmra.mrb[28].mxu0 %vm59_vm0, %v1836_v40  ;;  %v2722_v40 = vld [vmem:[%s3936_s4 + $0x30] ss:$8 sm:$0x3] }
 0x67d   :  { %3351 = vmatpush1.bf16.msra.mxu0 %v3350_v38  ;;  %2026 = vmatprep.mubr.f32.mxu0 %v3631_v0  ;;  %v1816_v38 = vshrl.u32 %v1815_v37, 7  ;;  %v2446_v37 = vld [vmem:[%s3935_s3 + $0x110] sm:$0xff] }
 0x67e   :  { %3417 = vmatprep.subr.bf16.mxu0 %v3416_v42  ;;  %3415 = vmatpush1.bf16.msra.mxu1 %v3414_v33  ;;  %v2341_v33 = vld [vmem:[%s3935_s3 + $0xf0] sm:$0xff] }
 0x67f   :  { %v1817_v39 = vsub.s32 0, %v1816_v38  ;;  %v1821_v41 = vsub.s32 1, %v1816_v38  ;;  %v2548_v38 = vld [vmem:[%s3935_s3 + $0x118] sm:$0xff] }
 0x680   :  { %2731 = vmatmul.mubr.msk.f32.vlgmr.msra.gmra.mrb[22].mxu0 %vm59_vm0, %v1946_v47 }
 0x681   :  { %2032 = vmatprep.mubr.f32.mxu0 %v3631_v0  ;;  %3419 = vmatpush3.bf16.msra.mxu0 %v3418_v48  ;;  %v1818_v42 = vrot.slane %v2722_v40, %v1817_v39  ;;  %v1822_v43 = vrot.slane %v2722_v40, %v1821_v41  ;;  %v2549_v39 = vld [vmem:[%s3935_s3 + $0x120] sm:$0xff]  ;;  %v2550_v40 = vld [vmem:[%s3935_s3 + $0x128] sm:$0xff]  ;;  %v2551_v41 = vld [vmem:[%s3935_s3 + $0x130] sm:$0xff] }
 0x682   :  { %3421 = vmatprep.subr.bf16.mxu0 %v3420_v49 }
 0x684   :  { %2732 = vmatmul.mubr.msk.f32.gmra.mrb[24].mxu0 %vm59_vm0, %v1947_v54 }
 0x685   :  { %2038 = vmatprep.mubr.f32.mxu0 %v3631_v0  ;;  %3423 = vmatpush3.bf16.msra.mxu0 %v3422_v55 }
 0x686   :  { %3425 = vmatprep.subr.bf16.mxu0 %v3424_v56 }
 0x688   :  { %2733 = vmatmul.mubr.msk.f32.gmra.mrb[26].mxu0 %vm59_vm0, %v1948_v61 }
 0x689   :  { %2044 = vmatprep.mubr.f32.mxu0 %v3631_v0  ;;  %3427 = vmatpush3.bf16.msra.mxu0 %v3426_v62  ;;  %v2102_v0 = vld [vmem:[#allocation2 + $0x448] sm:$0xff] }
 0x68a   :  { %3429 = vmatprep.subr.bf16.mxu0 %v3428_v63  ;;  %v3438_v17 = vpack.c.bf16 %v2102_v0, %v2099_v14 }
 0x68c   :  { %2734 = vmatmul.mubr.msk.f32.gmra.mrb[28].mxu0 %vm59_vm0, %v1949_v5  ;;  %v2338_v5 = vld [vmem:[%s3935_s3 + $0xd8] sm:$0xff] }
 0x68d   :  { %3431 = vmatpush3.bf16.msra.mxu0 %v3430_v6 }
 0x68e   :  { %3433 = vmatprep.subr.bf16.mxu0 %v3432_v7 }
 0x691   :  { %3435 = vmatpush3.bf16.msra.mxu0 %v3434_v12 }
 0x692   :  { %3437 = vmatprep.subr.bf16.mxu0 %v3436_v13 }
 0x695   :  { %3439 = vmatpush3.bf16.msra.mxu0 %v3438_v17 }
 0x696   :  { %3441 = vmatprep.subr.bf16.mxu0 %v3440_v18 }
 0x699   :  { %3443 = vmatpush3.bf16.msra.mxu0 %v3442_v24 }
 0x69a   :  { %3445 = vmatprep.subr.bf16.mxu0 %v3444_v32  ;;  %v2340_v32 = vld [vmem:[%s3935_s3 + $0xe8] sm:$0xff] }
 0x69d   :  { %3447 = vmatpush3.bf16.msra.mxu0 %v3446_v36  ;;  %v2445_v36 = vld [vmem:[%s3935_s3 + $0x108] sm:$0xff]  ;;  %s3634_s3 = smov [#allocation7]  }
 0x753   :  { %v2028_v44 = vpop.f32.mrb[22].mxu0 }
 0x754   :  { %v3477_v45 = vadd.f32 %v2028_v44, %v1818_v42  ;;  %v2030_v46 = vpop.f32.mrb[23].mxu0 }
 0x755   :  { %v3478_v47 = vadd.f32 %v2030_v46, %v1822_v43 }
 0x756   :  { %v2059_v50 = vmax.f32 %v3477_v45, 0.0 }
 0x757   :  { %v2060_v48 = vmax.f32 %v3478_v47, 0.0  ;;  %v2034_v49 = vpop.f32.mrb[24].mxu0 }
 0x758   :  { %v3479_v51 = vadd.f32 %v2034_v49, %v1818_v42  ;;  %v2036_v52 = vpop.f32.mrb[25].mxu0 }
 0x759   :  { %v3480_v53 = vadd.f32 %v2036_v52, %v1822_v43  ;;  %2227 = vmatprep.mubr.f32.mxu1 %v2060_v48  ;;  %2316 = vmatprep.mubr.f32.mxu0 %v2060_v48 }
 0x75a   :  { %2228 = vmatmul.mubr.f32.vlgmr.msra.gmra.mrb[18].mxu1 %v2059_v50  ;;  %2317 = vmatmul.mubr.f32.vlgmr.msra.gmra.mrb[30].mxu0 %v2059_v50  ;;  %v2061_v56 = vmax.f32 %v3479_v51, 0.0 }
 0x75b   :  { %v2062_v54 = vmax.f32 %v3480_v53, 0.0  ;;  %v2040_v55 = vpop.f32.mrb[26].mxu0 }
 0x75c   :  { %v3481_v57 = vadd.f32 %v2040_v55, %v1818_v42  ;;  %v2042_v58 = vpop.f32.mrb[27].mxu0 }
 0x75d   :  { %v3482_v59 = vadd.f32 %v2042_v58, %v1822_v43  ;;  %2233 = vmatprep.mubr.f32.mxu1 %v2062_v54  ;;  %2321 = vmatprep.mubr.f32.mxu0 %v2062_v54 }
 0x75e   :  { %2234 = vmatmul.mubr.f32.gmra.mrb[20].mxu1 %v2061_v56  ;;  %2322 = vmatmul.mubr.f32.gmra.mrb[32].mxu0 %v2061_v56  ;;  %v2063_v62 = vmax.f32 %v3481_v57, 0.0 }
 0x75f   :  { %v2064_v60 = vmax.f32 %v3482_v59, 0.0  ;;  %v2046_v61 = vpop.f32.mrb[28].mxu0 }
 0x760   :  { %v3483_v63 = vadd.f32 %v2046_v61, %v1818_v42  ;;  %v2048_v1 = vpop.f32.mrb[29].mxu0  ;;  %v2337_v42 = vld [vmem:[%s3936_s4 + $0x40] ss:$0 sm:$0xff]  ;;  %s2686_s4 = sshll.u32 %s3634_s3, 4  ;;  %s2687_s4 = int_to_ptr.vmem [resolvable:$true] %s2686_s4 }
 0x761   :  { %v3484_v2 = vadd.f32 %v2048_v1, %v1822_v43  ;;  %2239 = vmatprep.mubr.f32.mxu1 %v2064_v60  ;;  %2326 = vmatprep.mubr.f32.mxu0 %v2064_v60  ;;  %s3597_s30 = scalar_lea.vmem %s2687_s4, 512  ;;  %p3602_p3 = scmp.lt.s32.totalorder %s2687_s4, %s2687_s4 }
 0x762   :  { %2240 = vmatmul.mubr.f32.gmra.mrb[22].mxu1 %v2063_v62  ;;  %2327 = vmatmul.mubr.f32.gmra.mrb[34].mxu0 %v2063_v62  ;;  %v2065_v4 = vmax.f32 %v3483_v63, 0.0  ;;  %p3598_p2 = scmp.ne.s32.totalorder %s2687_s4, %s3597_s30  ;;  %p3603_p4 = scmp.lt.s32.totalorder %s3597_s30, %s3597_s30 }
 0x763   :  { %v2066_v3 = vmax.f32 %v3484_v2, 0.0 }
 0x764   :  { %p3604_p5 = por %p3603_p4, %p3602_p3 }
 0x765   :  { %2245 = vmatprep.mubr.f32.mxu1 %v2066_v3  ;;  %2331 = vmatprep.mubr.f32.mxu0 %v2066_v3 }
 0x766   :  { %2246 = vmatmul.mubr.f32.gmra.mrb[24].mxu1 %v2065_v4  ;;  %2332 = vmatmul.mubr.f32.gmra.mrb[36].mxu0 %v2065_v4  ;;  %p3605_p6 = pnand %p3604_p5, %p3598_p2 }
 0x767   :  { %3049 = vmatprep.mubr.msk.f32.mxu0 %vm249_vm1, %v2338_v5 }
 0x82d   :  { %v2229_v6 = vpop.f32.mrb[18].mxu1  ;;  %v2856_v7 = vpop.f32.mrb[30].mxu0 }
 0x82e   :  { %v2231_v8 = vpop.f32.mrb[19].mxu1  ;;  %v2857_v9 = vpop.f32.mrb[31].mxu0 }
 0x82f   :  { %v2858_v10 = vadd.f32 %v2857_v9, %v2856_v7 }
 0x831   :  { %v2235_v11 = vpop.f32.mrb[20].mxu1  ;;  %v2859_v12 = vpop.f32.mrb[32].mxu0 }
 0x832   :  { %v3448_v13 = vpack.c.bf16 %v2235_v11, %v2229_v6  ;;  %v2237_v14 = vpop.f32.mrb[21].mxu1  ;;  %v2860_v0 = vpop.f32.mrb[33].mxu0 }
 0x833   :  { %v3456_v15 = vpack.c.bf16 %v2237_v14, %v2231_v8  ;;  %v2861_v16 = vadd.f32 %v2860_v0, %v2859_v12 }
 0x834   :  { %3449 = vmatprep.subr.bf16.mxu0 %v3448_v13 }
 0x835   :  { %v3464_v17 = vpack.c.bf16 %v2861_v16, %v2858_v10  ;;  %v2241_v18 = vpop.f32.mrb[22].mxu1  ;;  %v2862_v19 = vpop.f32.mrb[34].mxu0  ;;  %3451 = vmatpush3.bf16.msra.mxu0 %v3448_v13 }
 0x836   :  { %v2243_v20 = vpop.f32.mrb[23].mxu1  ;;  %v2863_v21 = vpop.f32.mrb[35].mxu0 }
 0x837   :  { %v2864_v22 = vadd.f32 %v2863_v21, %v2862_v19 }
 0x839   :  { %v2247_v23 = vpop.f32.mrb[24].mxu1  ;;  %v2865_v24 = vpop.f32.mrb[36].mxu0 }
 0x83a   :  { %v3452_v25 = vpack.c.bf16 %v2247_v23, %v2241_v18  ;;  %v2249_v26 = vpop.f32.mrb[25].mxu1  ;;  %v2866_v27 = vpop.f32.mrb[37].mxu0 }
 0x83b   :  { %v3460_v28 = vpack.c.bf16 %v2249_v26, %v2243_v20  ;;  %v2867_v29 = vadd.f32 %v2866_v27, %v2865_v24 }
 0x83c   :  { %3453 = vmatprep.subr.bf16.mxu0 %v3452_v25 }
 0x83d   :  { %v3468_v30 = vpack.c.bf16 %v2867_v29, %v2864_v22  ;;  %3455 = vmatpush3.bf16.msra.mxu0 %v3452_v25 }
 0x83e   :  { %3457 = vmatprep.subr.bf16.mxu0 %v3456_v15 }
 0x840   :  { %3050 = vmatmul.mubr.msk.f32.vlgmr.msra.gmra.mrb[38].mxu0 %vm249_vm1, %v2339_v31 }
 0x841   :  { %3459 = vmatpush3.bf16.msra.mxu0 %v3456_v15  ;;  %3052 = vmatprep.mubr.msk.f32.mxu0 %vm249_vm1, %v2340_v32 }
 0x842   :  { %3461 = vmatprep.subr.bf16.mxu0 %v3460_v28 }
 0x844   :  { %3053 = vmatmul.mubr.msk.f32.gmra.mrb[40].mxu0 %vm249_vm1, %v2341_v33 }
 0x845   :  { %3463 = vmatpush3.bf16.msra.mxu0 %v3460_v28  ;;  %3063 = vmatprep.mubr.msk.f32.mxu0 %vm249_vm1, %v2443_v34 }
 0x846   :  { %3465 = vmatprep.subr.bf16.mxu0 %v3464_v17 }
 0x848   :  { %3064 = vmatmul.mubr.msk.f32.vlgmr.msra.gmra.mrb[38].mxu0 %vm249_vm1, %v2444_v35 }
 0x849   :  { %3467 = vmatpush3.bf16.msra.mxu0 %v3464_v17  ;;  %3066 = vmatprep.mubr.msk.f32.mxu0 %vm249_vm1, %v2445_v36 }
 0x84a   :  { %3469 = vmatprep.subr.bf16.mxu0 %v3468_v30 }
 0x84c   :  { %3067 = vmatmul.mubr.msk.f32.gmra.mrb[40].mxu0 %vm249_vm1, %v2446_v37 }
 0x84d   :  { %3471 = vmatpush3.bf16.msra.mxu0 %v3468_v30  ;;  %3077 = vmatprep.mubr.msk.f32.mxu0 %vm249_vm1, %v2548_v38 }
 0x850   :  { %3078 = vmatmul.mubr.msk.f32.vlgmr.msra.gmra.mrb[38].mxu0 %vm249_vm1, %v2549_v39 }
 0x851   :  { %3080 = vmatprep.mubr.msk.f32.mxu0 %vm249_vm1, %v2550_v40 }
 0x854   :  { %3081 = vmatmul.mubr.msk.f32.gmra.mrb[40].mxu0 %vm249_vm1, %v2551_v41 }
 0x923   :  { %v3079_v43 = vpop.f32.mrb[38].mxu0 }
 0x924   :  { %v3485_v44 = vadd.f32 %v3079_v43, %v2337_v42  ;;  %v2630_v45 = vpop.f32.mrb[39].mxu0 }
 0x925   :  { %v3486_v46 = vadd.f32 %v2630_v45, %v2337_v42 }
 0x926   :  { %v2654_v47 = vsub.f32 0.0, %v3485_v44 }
 0x927   :  { %v2653_v48 = vsub.f32 0.0, %v3486_v46  ;;  %v3082_v49 = vpop.f32.mrb[40].mxu0 }
 0x928   :  { %v2659_v50 = vmul.f32 1.442695, %v2654_v47  ;;  %v3487_v51 = vadd.f32 %v3082_v49, %v2337_v42  ;;  %v2640_v52 = vpop.f32.mrb[41].mxu0 }
 0x929   :  { %v2657_v53 = vmul.f32 1.442695, %v2653_v48  ;;  %v3488_v54 = vadd.f32 %v2640_v52, %v2337_v42 }
 0x92a   :  { %3537 = vpow2.f32 %v2659_v50  ;;  %v2656_v55 = vsub.f32 0.0, %v3487_v51 }
 0x92b   :  { %3539 = vpow2.f32 %v2657_v53  ;;  %v2655_v56 = vsub.f32 0.0, %v3488_v54 }
 0x92c   :  { %v2663_v57 = vmul.f32 1.442695, %v2656_v55 }
 0x92d   :  { %v2661_v58 = vmul.f32 1.442695, %v2655_v56 }
 0x92e   :  { %3541 = vpow2.f32 %v2663_v57 }
 0x92f   :  { %3543 = vpow2.f32 %v2661_v58 }
 0x934   :  { %v3538_v59 = vpop.eup %3537 }
 0x935   :  { %v3540_v60 = vpop.eup %3539  ;;  %v2666_v61 = vadd.f32 1.0, %v3538_v59 }
 0x936   :  { %v2665_v62 = vadd.f32 1.0, %v3540_v60 }
 0x937   :  { %3545 = vrcp.f32 %v2666_v61 }
 0x938   :  { %v3542_v63 = vpop.eup %3541  ;;  %3547 = vrcp.f32 %v2665_v62 }
 0x939   :  { %v3544_v1 = vpop.eup %3543  ;;  %v2668_v2 = vadd.f32 1.0, %v3542_v63 }
 0x93a   :  { %v2667_v3 = vadd.f32 1.0, %v3544_v1 }
 0x93b   :  { %3549 = vrcp.f32 %v2668_v2 }
 0x93c   :  { %3551 = vrcp.f32 %v2667_v3 }
 0x941   :  { %v3546_v4 = vpop.eup %3545 }
 0x942   :  { %v3548_v5 = vpop.eup %3547  ;;  %2678 = vst [vmem:[#allocation7 + $0x8] sm:$0xff] %v3546_v4 }
 0x943   :  { %2677 = vst [vmem:[#allocation7] sm:$0xff] %v3548_v5 }
 0x945   :  { %v3550_v6 = vpop.eup %3549 }
 0x946   :  { %v3552_v7 = vpop.eup %3551  ;;  %2680 = vst [vmem:[#allocation7 + $0x18] sm:$0xff] %v3550_v6 }
 0x947   :  { %2679 = vst [vmem:[#allocation7 + $0x10] sm:$0xff] %v3552_v7 }
 0x948   :  { %3608 = shalt.err (!%p3605_p6)
}
 0x949   :  { %s3609_s8 = scalar_lea.hbm %s3937_s5, 512 }
 0x94a   :  { %p3610_p7 = scmp.ne.s32.totalorder %s3937_s5, %s3609_s8  ;;  %p3613_p8 = scmp.lt.u32.totalorder %s3609_s8, %s3937_s5 }
 0x94c   :  { %p3615_p9 = pnand %p3613_p8, %p3610_p7 }
 0x94e   :  { %3618 = shalt.err (!%p3615_p9)
}
 0x94f   :  { %s3635_s13 = smov 128   ;;  %s3636_s14 = smov 8  }
 0x950   :  { %2692 = dma.vmem_to_hbm [thread:$0]  %s2687_s4, 512, %s3937_s5, [#allocation4], %s3635_s13, %s3635_s13, %s3636_s14  }
 0x951   :  { %3623 = dma.done.wait [#allocation4], 512  }
 0x952   :  { %3624 = vsyncadd [#allocation4], 4294966784 }
 0x953   :  { %2696 = vsyncpa [#allocation3], 1 }
 0x954   :  { %2697 = vsyncpa [#allocation6], 1 }
 0x955   :  { %2698 = vsyncpa [#allocation4], 1 }

</bundles_post_ra>
